<compile_context>
chip_gen: v7x
topology: tpu7x:2x2x1
jax: 0.10.0
libtpu: 0.0.40
codegen_flags: <defaults>
</compile_context>

<pallas_src>
import functools
import math

import numpy as np

import jax
import jax.numpy as jnp
from jax import lax
from jax.experimental import pallas as pl
from jax.experimental.pallas import tpu as pltpu


def _l2_normalize(v):
    # F.normalize(v, p=2, dim=1): v / clamp_min(||v||_2, 1e-12)
    # == v * rsqrt(clamp_min(||v||^2, 1e-24)); rsqrt lowers to the EUP slot.
    ss = jnp.sum(v * v, axis=1, keepdims=True)
    return v * lax.rsqrt(jnp.maximum(ss, 1e-24))


def _ceil_to(x, m):
    return ((x + m - 1) // m) * m


def _nbytes(shape, dtype):
    return math.prod(shape) * np.dtype(dtype).itemsize


def vital_kernel(
    ts_ref, eps_ref, txt_t_ref,
    w_enc_ref, b_enc_ref,
    *rest,
    out_dim, fuse_mulv, matmul_dtype,
):
    if fuse_mulv:
        (w_mulv_ref, b_mulv_ref, w_dec_ref, b_dec_ref,
         logits_ref, tshat_ref, mean_ref, logvar_ref, zn_ref) = rest
    else:
        (w_mu_ref, b_mu_ref, w_lv_ref, b_lv_ref, w_dec_ref, b_dec_ref,
         logits_ref, tshat_ref, mean_ref, logvar_ref, zn_ref) = rest

    f32 = jnp.float32

    def mm(a, b):
        # bf16 (or f32) MXU operands, always f32 accumulation.
        return jnp.dot(a.astype(matmul_dtype), b.astype(matmul_dtype),
                       preferred_element_type=f32)

    # Column-invariant work: only on the first text-column step of each row
    # tile. z_n lives in a VMEM scratch and is reused for every column tile.
    @pl.when(pl.program_id(1) == 0)
    def _row_tile_compute():
        ts = ts_ref[...]                      # [TB, ts_dim]  (matmul dtype)
        eps = eps_ref[...].astype(f32)        # [TB, out_dim] (randn_like sample)

        # ---------------- TSEncoder ----------------
        # LocalNorm's (x_mean, x_std) are computed in PyTorch but never used in
        # the returned values -> not materialized here.
        x_enc = mm(ts, w_enc_ref[...]) + b_enc_ref[...]

        if fuse_mulv:
            # Fused mean/logvar projection: one N = 2*out_dim lane-dense matmul
            # (only taken when out_dim % 128 == 0 so slices are lane-aligned).
            mulv = mm(x_enc, w_mulv_ref[...]) + b_mulv_ref[...]
            mean = mulv[:, :out_dim]
            log_var = mulv[:, out_dim:]
        else:
            mean = mm(x_enc, w_mu_ref[...]) + b_mu_ref[...]
            log_var = mm(x_enc, w_lv_ref[...]) + b_lv_ref[...]

        # reparameterization: z = mean + exp(0.5 * log_var) * epsilon  (ep = 1)
        z = mean + jnp.exp(0.5 * log_var) * eps

        z_n = _l2_normalize(z)
        mean_n = _l2_normalize(mean)
        zn_ref[...] = z_n.astype(matmul_dtype)

        # ---------------- TSDecoder ----------------
        # concat_embeddings=False -> decode_input = z (normalized);
        # 1-required-arg linear decoder (TSDecoder branch: x_hat = decoder(ts_emb)).
        tshat_ref[...] = mm(z_n, w_dec_ref[...]) + b_dec_ref[...]

        mean_ref[...] = mean_n               # TSEncoder returns the *normalized* mean
        logvar_ref[...] = log_var

    # ---------------- CLIP logits ----------------
    # clip_mu=False -> logits = z_n @ text_embedded.T. The text branch was
    # encoded / normalized / transposed outside the grid, so this is a plain
    # lane-dense [TB, D] @ [D, TN] matmul per (row, column) tile.
    logits_ref[...] = jnp.dot(
        zn_ref[...], txt_t_ref[...], preferred_element_type=f32
    ).astype(logits_ref.dtype)


def vital_forward(ts, text_features, eps, params, *,
                  batch_tile=256, text_tile=256,
                  use_bf16_matmul=True, logits_dtype=jnp.float32):
    B, ts_dim = ts.shape
    n_text = text_features.shape[0]
    out_dim = params["w_mu"].shape[1]
    f32 = jnp.float32
    md = jnp.bfloat16 if use_bf16_matmul else f32
    cast = lambda x: x.astype(md)

    # ---- Text branch hoisted out of the grid: encode + normalize ONCE in XLA,
    # pass pre-transposed [out_dim, n_text] so the kernel's logits matmul is a
    # plain x @ W with a lane-dense RHS.
    tx = jnp.dot(cast(text_features), cast(params["w_txt"]),
                 preferred_element_type=f32) + params["b_txt"].astype(f32)
    tx_n = tx * lax.rsqrt(jnp.maximum(jnp.sum(tx * tx, axis=1, keepdims=True), 1e-24))
    txt_t = cast(tx_n).T                                    # [out_dim, n_text]

    # ---- Tile sizes; pad batch rows / text columns to tile multiples.
    tb = min(batch_tile, B)
    tn = min(text_tile, n_text)
    b_pad = _ceil_to(B, tb)
    n_pad = _ceil_to(n_text, tn)

    ts_p = cast(ts)
    eps_p = eps.astype(f32)
    if b_pad != B:
        ts_p = jnp.pad(ts_p, ((0, b_pad - B), (0, 0)))
        eps_p = jnp.pad(eps_p, ((0, b_pad - B), (0, 0)))
    if n_pad != n_text:
        txt_t = jnp.pad(txt_t, ((0, 0), (0, n_pad - n_text)))

    # ---- mean/logvar projection: fuse into one [D, 2D] matmul only when the
    # lane slices stay 128-aligned.
    fuse_mulv = (out_dim % 128 == 0)
    if fuse_mulv:
        proj_inputs = [
            cast(jnp.concatenate([params["w_mu"], params["w_lv"]], axis=1)),
            jnp.concatenate([params["b_mu"], params["b_lv"]], axis=1).astype(f32),
        ]
        proj_blocks = [((out_dim, 2 * out_dim), md), ((1, 2 * out_dim), f32)]
    else:
        proj_inputs = [cast(params["w_mu"]), params["b_mu"].astype(f32),
                       cast(params["w_lv"]), params["b_lv"].astype(f32)]
        proj_blocks = [((out_dim, out_dim), md), ((1, out_dim), f32),
                       ((out_dim, out_dim), md), ((1, out_dim), f32)]

    w_enc, b_enc = cast(params["w_enc"]), params["b_enc"].astype(f32)
    w_dec, b_dec = cast(params["w_dec"]), params["b_dec"].astype(f32)

    grid = (b_pad // tb, n_pad // tn)

    row_spec = lambda cols: pl.BlockSpec((tb, cols), lambda i, j: (i, 0))
    const_spec = lambda shape: pl.BlockSpec(shape, lambda i, j: (0, 0))   # VMEM-resident

    in_specs = [
        row_spec(ts_dim),                                   # ts      (batch tiled)
        row_spec(out_dim),                                  # eps     (batch tiled)
        pl.BlockSpec((out_dim, tn), lambda i, j: (0, j)),   # text^T  (column tiled)
        const_spec((ts_dim, out_dim)),                      # w_enc
        const_spec((1, out_dim)),                           # b_enc
        *[const_spec(s) for s, _ in proj_blocks],           # mean/logvar projection
        const_spec((out_dim, ts_dim)),                      # w_dec
        const_spec((1, ts_dim)),                            # b_dec
    ]
    out_specs = (
        pl.BlockSpec((tb, tn), lambda i, j: (i, j)),        # logits
        row_spec(ts_dim),                                   # ts_hat
        row_spec(out_dim),                                  # mean
        row_spec(out_dim),                                  # log_var
    )
    out_shapes = (
        jax.ShapeDtypeStruct((b_pad, n_pad), logits_dtype),
        jax.ShapeDtypeStruct((b_pad, ts_dim), f32),
        jax.ShapeDtypeStruct((b_pad, out_dim), f32),
        jax.ShapeDtypeStruct((b_pad, out_dim), f32),
    )

    # ---- VMEM budget from the actual tile footprint (double-buffered blocks +
    # scratch, ~50% headroom) so larger tiles are not blocked by the default
    # scoped limit (16 MiB v5e / 32 MiB v6e,v7x).
    in_blocks = [((tb, ts_dim), md), ((tb, out_dim), f32), ((out_dim, tn), md),
                 ((ts_dim, out_dim), md), ((1, out_dim), f32),
                 *proj_blocks,
                 ((out_dim, ts_dim), md), ((1, ts_dim), f32)]
    out_blocks = [((tb, tn), logits_dtype), ((tb, ts_dim), f32),
                  ((tb, out_dim), f32), ((tb, out_dim), f32)]
    block_bytes = 2 * sum(_nbytes(s, d) for s, d in in_blocks + out_blocks)
    block_bytes += _nbytes((tb, out_dim), md)               # z_n scratch
    vmem_limit = int(min(120 << 20, max(block_bytes * 3 // 2 + (4 << 20), 32 << 20)))

    # ---- Advisory cost estimate (lets XLA overlap the hoisted text encode /
    # casts / pads with the kernel).
    flops = (2 * b_pad * (ts_dim * out_dim + 2 * out_dim * out_dim + out_dim * ts_dim)
             + 2 * b_pad * n_pad * out_dim)
    in_arrays = [ts_p, eps_p, txt_t, w_enc, b_enc, *proj_inputs, w_dec, b_dec]
    bytes_accessed = (sum(int(x.size) * np.dtype(x.dtype).itemsize for x in in_arrays)
                      + sum(_nbytes(s.shape, s.dtype) for s in out_shapes))

    kernel = functools.partial(vital_kernel, out_dim=out_dim,
                               fuse_mulv=fuse_mulv, matmul_dtype=md)

    logits, ts_hat, mean, log_var = pl.pallas_call(
        kernel,
        out_shape=out_shapes,
        grid=grid,
        in_specs=in_specs,
        out_specs=out_specs,
        scratch_shapes=[pltpu.VMEM((tb, out_dim), md)],     # z_n, reused across j
        compiler_params=pltpu.CompilerParams(
            dimension_semantics=("parallel", "arbitrary"),  # rows megacore-parallel
            vmem_limit_bytes=vmem_limit),
        cost_estimate=pl.CostEstimate(
            flops=int(flops),
            transcendentals=int(b_pad * out_dim + 2 * b_pad),
            bytes_accessed=int(bytes_accessed)),
    )(ts_p, eps_p, txt_t, w_enc, b_enc, *proj_inputs, w_dec, b_dec)

    # Slice away row / column padding.
    if n_pad != n_text:
        logits = logits[:, :n_text]
    if b_pad != B:
        logits = logits[:B]
        ts_hat, mean, log_var = ts_hat[:B], mean[:B], log_var[:B]
    return logits, ts_hat, mean, log_var


def vital_reference(ts, text_features, eps, params, *, use_bf16_matmul=True):
    """Pure-JAX reference mirroring the kernel's dtype policy (for validation)."""
    f32 = jnp.float32
    md = jnp.bfloat16 if use_bf16_matmul else f32
    mm = lambda a, b: jnp.dot(a.astype(md), b.astype(md), preferred_element_type=f32)

    def l2n(v):
        n = jnp.sqrt(jnp.sum(v * v, axis=1, keepdims=True))
        return v / jnp.maximum(n, 1e-12)

    x_enc = mm(ts, params["w_enc"]) + params["b_enc"]
    mean = mm(x_enc, params["w_mu"]) + params["b_mu"]
    log_var = mm(x_enc, params["w_lv"]) + params["b_lv"]
    z = mean + jnp.exp(0.5 * log_var) * eps
    z_n, mean_n = l2n(z), l2n(mean)
    tx_n = l2n(mm(text_features, params["w_txt"]) + params["b_txt"])
    logits = jnp.dot(z_n.astype(md), tx_n.astype(md).T, preferred_element_type=f32)
    ts_hat = mm(z_n, params["w_dec"]) + params["b_dec"]
    return logits, ts_hat, mean_n, log_var


def init_params(key, ts_dim, text_dim, output_dim):
    """Deterministic nn.Linear-style init: U(-1/sqrt(fan_in), 1/sqrt(fan_in))."""
    def linear(k, fan_in, fan_out):
        kw, kb = jax.random.split(k)
        bound = 1.0 / jnp.sqrt(fan_in)
        w = jax.random.uniform(kw, (fan_in, fan_out), jnp.float32, -bound, bound)
        b = jax.random.uniform(kb, (1, fan_out), jnp.float32, -bound, bound)
        return w, b

    k1, k2, k3, k4, k5 = jax.random.split(key, 5)
    w_enc, b_enc = linear(k1, ts_dim, output_dim)      # ts encoder_layers
    w_mu, b_mu = linear(k2, output_dim, output_dim)    # mean_layer
    w_lv, b_lv = linear(k3, output_dim, output_dim)    # logvar_layer
    w_txt, b_txt = linear(k4, text_dim, output_dim)    # text encoder_layers
    w_dec, b_dec = linear(k5, output_dim, ts_dim)      # ts decoder_layers
    return dict(
        w_enc=w_enc, b_enc=b_enc, w_mu=w_mu, b_mu=b_mu,
        w_lv=w_lv, b_lv=b_lv, w_txt=w_txt, b_txt=b_txt,
        w_dec=w_dec, b_dec=b_dec,
    )


if __name__ == "__main__":
    key = jax.random.PRNGKey(0)

    cases = [
        # (name, B, ts_dim, text_dim, out_dim, batch_tile, text_tile)
        ("single-step", 256, 256, 128, 128, 256, 256),  # grid (1,1): demo-size fast path
        ("tiled-2x2",   256, 256, 128, 128, 128, 128),  # 2-D grid + z_n scratch reuse
        ("padded",      200, 256,  96,  64, 128, 128),  # non-multiple B + non-fused proj
    ]

    for idx, (name, B, ts_dim, text_dim, out_dim, tb, tn) in enumerate(cases):
        k = jax.random.fold_in(key, idx)
        k_ts, k_txt, k_eps, k_p = jax.random.split(k, 4)

        ts = jax.random.normal(k_ts, (B, ts_dim), jnp.float32)
        text_features = jax.random.normal(k_txt, (B, text_dim), jnp.float32)
        eps = jax.random.normal(k_eps, (B, out_dim), jnp.float32)   # torch.randn_like
        params = init_params(k_p, ts_dim, text_dim, out_dim)

        fwd = jax.jit(functools.partial(vital_forward, batch_tile=tb, text_tile=tn))
        outs = jax.block_until_ready(fwd(ts, text_features, eps, params))
        logits, ts_hat, mean, log_var = outs

        assert logits.shape == (B, B)
        assert ts_hat.shape == (B, ts_dim)
        assert mean.shape == (B, out_dim)
        assert log_var.shape == (B, out_dim)

        # Loose tolerance: bf16 MXU operands (f32 accumulation).
        ref = vital_reference(ts, text_features, eps, params)
        for got, want in zip(outs, ref):
            assert jnp.allclose(got, want, rtol=5e-2, atol=5e-2), \
                f"mismatch vs reference ({name})"

    print("KERNEL_OK")
</pallas_src>

<mosaic_0001>
module attributes {stable_mosaic.version = 11 : i64} {
  func.func @vital_kernel(%arg0: i32, %arg1: i32, %arg2: memref<256x256xbf16, #tpu.memory_space<vmem>>, %arg3: memref<256x128xf32, #tpu.memory_space<vmem>>, %arg4: memref<128x256xbf16, #tpu.memory_space<vmem>>, %arg5: memref<256x128xbf16, #tpu.memory_space<vmem>>, %arg6: memref<1x128xf32, #tpu.memory_space<vmem>>, %arg7: memref<128x256xbf16, #tpu.memory_space<vmem>>, %arg8: memref<1x256xf32, #tpu.memory_space<vmem>>, %arg9: memref<128x256xbf16, #tpu.memory_space<vmem>>, %arg10: memref<1x256xf32, #tpu.memory_space<vmem>>, %arg11: memref<256x256xf32, #tpu.memory_space<vmem>>, %arg12: memref<256x256xf32, #tpu.memory_space<vmem>>, %arg13: memref<256x128xf32, #tpu.memory_space<vmem>>, %arg14: memref<256x128xf32, #tpu.memory_space<vmem>>, %arg15: memref<256x128xbf16, #tpu.memory_space<vmem>>) attributes {dimension_semantics = [#tpu.dimension_semantics<parallel>, #tpu.dimension_semantics<arbitrary>], iteration_bounds = array<i64: 1, 1>, scalar_prefetch = 0 : i64, scratch_operands = 1 : i64, tpu.core_type = #tpu.core_type<tc>, window_params = [{transform_indices = @transform_0, window_bounds = array<i64: 256, 256>}, {transform_indices = @transform_1, window_bounds = array<i64: 256, 128>}, {transform_indices = @transform_2, window_bounds = array<i64: 128, 256>}, {pipeline_mode = #tpu.pipeline_mode<synchronous>, transform_indices = @transform_3, window_bounds = array<i64: 256, 128>}, {pipeline_mode = #tpu.pipeline_mode<synchronous>, transform_indices = @transform_4, window_bounds = array<i64: 1, 128>}, {pipeline_mode = #tpu.pipeline_mode<synchronous>, transform_indices = @transform_5, window_bounds = array<i64: 128, 256>}, {pipeline_mode = #tpu.pipeline_mode<synchronous>, transform_indices = @transform_6, window_bounds = array<i64: 1, 256>}, {pipeline_mode = #tpu.pipeline_mode<synchronous>, transform_indices = @transform_7, window_bounds = array<i64: 128, 256>}, {pipeline_mode = #tpu.pipeline_mode<synchronous>, transform_indices = @transform_8, window_bounds = array<i64: 1, 256>}, {transform_indices = @transform_9, window_bounds = array<i64: 256, 256>}, {transform_indices = @transform_10, window_bounds = array<i64: 256, 256>}, {transform_indices = @transform_11, window_bounds = array<i64: 256, 128>}, {transform_indices = @transform_12, window_bounds = array<i64: 256, 128>}]} {
    %c0_i32 = arith.constant 0 : i32
    %0 = arith.cmpi eq, %arg1, %c0_i32 : i32
    %1 = arith.extui %0 : i1 to i32
    %c0_i32_0 = arith.constant 0 : i32
    %2 = arith.cmpi ne, %1, %c0_i32_0 : i32
    scf.if %2 {
      %c0_6 = arith.constant 0 : index
      %c0_7 = arith.constant 0 : index
      %7 = vector.load %arg2[%c0_6, %c0_7] : memref<256x256xbf16, #tpu.memory_space<vmem>>, vector<256x256xbf16>
      %c0_8 = arith.constant 0 : index
      %c0_9 = arith.constant 0 : index
      %8 = vector.load %arg3[%c0_8, %c0_9] : memref<256x128xf32, #tpu.memory_space<vmem>>, vector<256x128xf32>
      %c0_10 = arith.constant 0 : index
      %c0_11 = arith.constant 0 : index
      %9 = vector.load %arg5[%c0_10, %c0_11] : memref<256x128xbf16, #tpu.memory_space<vmem>>, vector<256x128xbf16>
      %cst_12 = arith.constant dense<0.000000e+00> : vector<256x128xf32>
      %10 = tpu.matmul %7, %9, %cst_12 {dimension_numbers = #tpu.dot_dimension_numbers<[1], [0], [0], [1], [0, 0, 1, 1], [], []>} : vector<256x256xbf16>, vector<256x128xbf16>, vector<256x128xf32> -> vector<256x128xf32>
      %c0_13 = arith.constant 0 : index
      %c0_14 = arith.constant 0 : index
      %11 = vector.load %arg6[%c0_13, %c0_14] : memref<1x128xf32, #tpu.memory_space<vmem>>, vector<1x128xf32>
      %12 = vector.broadcast %11 : vector<1x128xf32> to vector<256x128xf32>
      %13 = arith.addf %10, %12 : vector<256x128xf32>
      %c0_15 = arith.constant 0 : index
      %c0_16 = arith.constant 0 : index
      %14 = vector.load %arg7[%c0_15, %c0_16] : memref<128x256xbf16, #tpu.memory_space<vmem>>, vector<128x256xbf16>
      %15 = arith.truncf %13 : vector<256x128xf32> to vector<256x128xbf16>
      %cst_17 = arith.constant dense<0.000000e+00> : vector<256x256xf32>
      %16 = tpu.matmul %15, %14, %cst_17 {dimension_numbers = #tpu.dot_dimension_numbers<[1], [0], [0], [1], [0, 0, 1, 1], [], []>} : vector<256x128xbf16>, vector<128x256xbf16>, vector<256x256xf32> -> vector<256x256xf32>
      %c0_18 = arith.constant 0 : index
      %c0_19 = arith.constant 0 : index
      %17 = vector.load %arg8[%c0_18, %c0_19] : memref<1x256xf32, #tpu.memory_space<vmem>>, vector<1x256xf32>
      %18 = vector.broadcast %17 : vector<1x256xf32> to vector<256x256xf32>
      %19 = arith.addf %16, %18 : vector<256x256xf32>
      %20 = vector.extract_strided_slice %19 {offsets = [0, 0], sizes = [256, 128], strides = [1, 1]} : vector<256x256xf32> to vector<256x128xf32>
      %21 = vector.extract_strided_slice %19 {offsets = [0, 128], sizes = [256, 128], strides = [1, 1]} : vector<256x256xf32> to vector<256x128xf32>
      %cst_20 = arith.constant 5.000000e-01 : f32
      %22 = vector.broadcast %cst_20 : f32 to vector<256x128xf32>
      %23 = arith.mulf %22, %21 : vector<256x128xf32>
      %24 = math.exp %23 : vector<256x128xf32>
      %25 = arith.mulf %24, %8 : vector<256x128xf32>
      %26 = arith.addf %20, %25 : vector<256x128xf32>
      %27 = arith.mulf %26, %26 : vector<256x128xf32>
      %cst_21 = arith.constant dense<0.000000e+00> : vector<256xf32>
      %28 = vector.multi_reduction <add>, %27, %cst_21 [1] : vector<256x128xf32> to vector<256xf32>
      %29 = vector.shape_cast %28 : vector<256xf32> to vector<256x1xf32>
      %cst_22 = arith.constant 1.000000e-24 : f32
      %30 = vector.broadcast %cst_22 : f32 to vector<256x1xf32>
      %31 = arith.maximumf %29, %30 : vector<256x1xf32>
      %32 = math.rsqrt %31 : vector<256x1xf32>
      %33 = vector.broadcast %32 : vector<256x1xf32> to vector<256x128xf32>
      %34 = arith.mulf %26, %33 : vector<256x128xf32>
      %35 = arith.mulf %20, %20 : vector<256x128xf32>
      %cst_23 = arith.constant dense<0.000000e+00> : vector<256xf32>
      %36 = vector.multi_reduction <add>, %35, %cst_23 [1] : vector<256x128xf32> to vector<256xf32>
      %37 = vector.shape_cast %36 : vector<256xf32> to vector<256x1xf32>
      %cst_24 = arith.constant 1.000000e-24 : f32
      %38 = vector.broadcast %cst_24 : f32 to vector<256x1xf32>
      %39 = arith.maximumf %37, %38 : vector<256x1xf32>
      %40 = math.rsqrt %39 : vector<256x1xf32>
      %41 = vector.broadcast %40 : vector<256x1xf32> to vector<256x128xf32>
      %42 = arith.mulf %20, %41 : vector<256x128xf32>
      %43 = arith.truncf %34 : vector<256x128xf32> to vector<256x128xbf16>
      %c0_25 = arith.constant 0 : index
      %c0_26 = arith.constant 0 : index
      %44 = vector.load %arg15[%c0_25, %c0_26] : memref<256x128xbf16, #tpu.memory_space<vmem>>, vector<256x128xbf16>
      tpu.vector_store %arg15[%c0_25, %c0_26], %43 {strides = array<i32>} : memref<256x128xbf16, #tpu.memory_space<vmem>>, vector<256x128xbf16>,
      %c0_27 = arith.constant 0 : index
      %c0_28 = arith.constant 0 : index
      %45 = vector.load %arg9[%c0_27, %c0_28] : memref<128x256xbf16, #tpu.memory_space<vmem>>, vector<128x256xbf16>
      %46 = arith.truncf %34 : vector<256x128xf32> to vector<256x128xbf16>
      %cst_29 = arith.constant dense<0.000000e+00> : vector<256x256xf32>
      %47 = tpu.matmul %46, %45, %cst_29 {dimension_numbers = #tpu.dot_dimension_numbers<[1], [0], [0], [1], [0, 0, 1, 1], [], []>} : vector<256x128xbf16>, vector<128x256xbf16>, vector<256x256xf32> -> vector<256x256xf32>
      %c0_30 = arith.constant 0 : index
      %c0_31 = arith.constant 0 : index
      %48 = vector.load %arg10[%c0_30, %c0_31] : memref<1x256xf32, #tpu.memory_space<vmem>>, vector<1x256xf32>
      %49 = vector.broadcast %48 : vector<1x256xf32> to vector<256x256xf32>
      %50 = arith.addf %47, %49 : vector<256x256xf32>
      %c0_32 = arith.constant 0 : index
      %c0_33 = arith.constant 0 : index
      %51 = vector.load %arg12[%c0_32, %c0_33] : memref<256x256xf32, #tpu.memory_space<vmem>>, vector<256x256xf32>
      tpu.vector_store %arg12[%c0_32, %c0_33], %50 {strides = array<i32>} : memref<256x256xf32, #tpu.memory_space<vmem>>, vector<256x256xf32>,
      %c0_34 = arith.constant 0 : index
      %c0_35 = arith.constant 0 : index
      %52 = vector.load %arg13[%c0_34, %c0_35] : memref<256x128xf32, #tpu.memory_space<vmem>>, vector<256x128xf32>
      tpu.vector_store %arg13[%c0_34, %c0_35], %42 {strides = array<i32>} : memref<256x128xf32, #tpu.memory_space<vmem>>, vector<256x128xf32>,
      %c0_36 = arith.constant 0 : index
      %c0_37 = arith.constant 0 : index
      %53 = vector.load %arg14[%c0_36, %c0_37] : memref<256x128xf32, #tpu.memory_space<vmem>>, vector<256x128xf32>
      tpu.vector_store %arg14[%c0_36, %c0_37], %21 {strides = array<i32>} : memref<256x128xf32, #tpu.memory_space<vmem>>, vector<256x128xf32>,
    } else {
    }
    %c0 = arith.constant 0 : index
    %c0_1 = arith.constant 0 : index
    %3 = vector.load %arg15[%c0, %c0_1] : memref<256x128xbf16, #tpu.memory_space<vmem>>, vector<256x128xbf16>
    %c0_2 = arith.constant 0 : index
    %c0_3 = arith.constant 0 : index
    %4 = vector.load %arg4[%c0_2, %c0_3] : memref<128x256xbf16, #tpu.memory_space<vmem>>, vector<128x256xbf16>
    %cst = arith.constant dense<0.000000e+00> : vector<256x256xf32>
    %5 = tpu.matmul %3, %4, %cst {dimension_numbers = #tpu.dot_dimension_numbers<[1], [0], [0], [1], [0, 0, 1, 1], [], []>} : vector<256x128xbf16>, vector<128x256xbf16>, vector<256x256xf32> -> vector<256x256xf32>
    %c0_4 = arith.constant 0 : index
    %c0_5 = arith.constant 0 : index
    %6 = vector.load %arg11[%c0_4, %c0_5] : memref<256x256xf32, #tpu.memory_space<vmem>>, vector<256x256xf32>
    tpu.vector_store %arg11[%c0_4, %c0_5], %5 {strides = array<i32>} : memref<256x256xf32, #tpu.memory_space<vmem>>, vector<256x256xf32>,
    return
  }
  func.func @transform_0(%arg0: i32, %arg1: i32) -> (i32, i32) {
    %c0_i32 = arith.constant 0 : i32
    %c0_i32_0 = arith.constant 0 : i32
    return %arg0, %c0_i32 : i32, i32
  }
  func.func @transform_1(%arg0: i32, %arg1: i32) -> (i32, i32) {
    %c0_i32 = arith.constant 0 : i32
    %c0_i32_0 = arith.constant 0 : i32
    return %arg0, %c0_i32 : i32, i32
  }
  func.func @transform_2(%arg0: i32, %arg1: i32) -> (i32, i32) {
    %c0_i32 = arith.constant 0 : i32
    %c0_i32_0 = arith.constant 0 : i32
    return %c0_i32, %arg1 : i32, i32
  }
  func.func @transform_3(%arg0: i32, %arg1: i32) -> (i32, i32) {
    %c0_i32 = arith.constant 0 : i32
    %c0_i32_0 = arith.constant 0 : i32
    %c0_i32_1 = arith.constant 0 : i32
    return %c0_i32, %c0_i32_0 : i32, i32
  }
  func.func @transform_4(%arg0: i32, %arg1: i32) -> (i32, i32) {
    %c0_i32 = arith.constant 0 : i32
    %c0_i32_0 = arith.constant 0 : i32
    %c0_i32_1 = arith.constant 0 : i32
    return %c0_i32, %c0_i32_0 : i32, i32
  }
  func.func @transform_5(%arg0: i32, %arg1: i32) -> (i32, i32) {
    %c0_i32 = arith.constant 0 : i32
    %c0_i32_0 = arith.constant 0 : i32
    %c0_i32_1 = arith.constant 0 : i32
    return %c0_i32, %c0_i32_0 : i32, i32
  }
  func.func @transform_6(%arg0: i32, %arg1: i32) -> (i32, i32) {
    %c0_i32 = arith.constant 0 : i32
    %c0_i32_0 = arith.constant 0 : i32
    %c0_i32_1 = arith.constant 0 : i32
    return %c0_i32, %c0_i32_0 : i32, i32
  }
  func.func @transform_7(%arg0: i32, %arg1: i32) -> (i32, i32) {
    %c0_i32 = arith.constant 0 : i32
    %c0_i32_0 = arith.constant 0 : i32
    %c0_i32_1 = arith.constant 0 : i32
    return %c0_i32, %c0_i32_0 : i32, i32
  }
  func.func @transform_8(%arg0: i32, %arg1: i32) -> (i32, i32) {
    %c0_i32 = arith.constant 0 : i32
    %c0_i32_0 = arith.constant 0 : i32
    %c0_i32_1 = arith.constant 0 : i32
    return %c0_i32, %c0_i32_0 : i32, i32
  }
  func.func @transform_9(%arg0: i32, %arg1: i32) -> (i32, i32) {
    %c0_i32 = arith.constant 0 : i32
    return %arg0, %arg1 : i32, i32
  }
  func.func @transform_10(%arg0: i32, %arg1: i32) -> (i32, i32) {
    %c0_i32 = arith.constant 0 : i32
    %c0_i32_0 = arith.constant 0 : i32
    return %arg0, %c0_i32 : i32, i32
  }
  func.func @transform_11(%arg0: i32, %arg1: i32) -> (i32, i32) {
    %c0_i32 = arith.constant 0 : i32
    %c0_i32_0 = arith.constant 0 : i32
    return %arg0, %c0_i32 : i32, i32
  }
  func.func @transform_12(%arg0: i32, %arg1: i32) -> (i32, i32) {
    %c0_i32 = arith.constant 0 : i32
    %c0_i32_0 = arith.constant 0 : i32
    return %arg0, %c0_i32 : i32, i32
  }
}

</mosaic_0001>

<bundles_post_ra>
// kernel: vital_forward.1
= control target key start
LH: loop header
LB: loop body
LE: loop exit
PB: predicated region body
PF: predicated region fallthrough
CT: control target
= control target key end

     0   :  { %18 = vsyncpa [#allocation4], 0  ;;  %s4157_s0 = inlined_call_operand.vmem [shape: bf16[256,256], index: 0, kind: input, shape index: {}]   ;;  %s4158_s1 = inlined_call_operand.vmem [shape: f32[256,128], index: 1, kind: input, shape index: {}]   ;;  %s4159_s2 = inlined_call_operand.vmem [shape: bf16[128,256], index: 2, kind: input, shape index: {}]   ;;  %s4160_s3 = inlined_call_operand.vmem [shape: bf16[256,128], index: 3, kind: input, shape index: {}]   ;;  %s4161_s4 = inlined_call_operand.vmem [shape: f32[1,128], index: 4, kind: input, shape index: {}]   ;;  %s4162_s5 = inlined_call_operand.vmem [shape: bf16[128,256], index: 5, kind: input, shape index: {}]   ;;  %s4163_s6 = inlined_call_operand.vmem [shape: f32[1,256], index: 6, kind: input, shape index: {}]   ;;  %s4164_s7 = inlined_call_operand.vmem [shape: bf16[128,256], index: 7, kind: input, shape index: {}]   ;;  %s4165_s8 = inlined_call_operand.vmem [shape: f32[1,256], index: 8, kind: input, shape index: {}]   ;;  %s4166_s9 = inlined_call_operand.hbm [shape: f32[256,256], index: 9, kind: output, shape index: {0}]   ;;  %s4167_s10 = inlined_call_operand.hbm [shape: f32[256,256], index: 10, kind: output, shape index: {1}]   ;;  %s4168_s11 = inlined_call_operand.hbm [shape: f32[256,128], index: 11, kind: output, shape index: {2}]   ;;  %s4169_s12 = inlined_call_operand.hbm [shape: f32[256,128], index: 12, kind: output, shape index: {3}]  }
   0x1   :  { %19 = vsyncpa [#allocation6], 0  ;;  %v2536_v0 = vld [vmem:[%s4160_s3 + $0x40] sm:$0xff]   ;;  %v2538_v2 = vld [vmem:[%s4160_s3 + $0x48] sm:$0xff]  }
   0x2   :  { %v2537_v1 = vld [vmem:[%s4160_s3] sm:$0xff]   ;;  %2415 = vmatprep.subr.bf16.mxu0 %v2536_v0  ;;  %v2539_v3 = vld [vmem:[%s4160_s3 + $0x8] sm:$0xff]   ;;  %v2540_v4 = vld [vmem:[%s4160_s3 + $0x50] sm:$0xff]  }
   0x3   :  { %2416 = vmatpush3.bf16.msra.mxu0 %v2537_v1  ;;  %v2541_v5 = vld [vmem:[%s4160_s3 + $0x10] sm:$0xff]   ;;  %v2542_v6 = vld [vmem:[%s4160_s3 + $0x58] sm:$0xff]   ;;  %v2544_v8 = vld [vmem:[%s4160_s3 + $0x60] sm:$0xff]  }
   0x4   :  { %2417 = vmatprep.subr.bf16.mxu0 %v2538_v2  ;;  %v2543_v7 = vld [vmem:[%s4160_s3 + $0x18] sm:$0xff]   ;;  %v2545_v9 = vld [vmem:[%s4160_s3 + $0x20] sm:$0xff]   ;;  %v2546_v10 = vld [vmem:[%s4160_s3 + $0x68] sm:$0xff]  }
   0x5   :  { %v2554_v11 = vld [vmem:[%s4157_s0 + $0x4] ss:$8 sps:$4 sm:$0xff]   ;;  %v2548_v13 = vld [vmem:[%s4160_s3 + $0x70] sm:$0xff]   ;;  %v2550_v15 = vld [vmem:[%s4160_s3 + $0x78] sm:$0xff]  }
   0x6   :  { %v2547_v12 = vld [vmem:[%s4160_s3 + $0x28] sm:$0xff]   ;;  %435 = vmatprep.mubr.bf16.mxu0 %v2554_v11  ;;  %v2549_v14 = vld [vmem:[%s4160_s3 + $0x30] sm:$0xff]   ;;  %v2551_v16 = vld [vmem:[%s4160_s3 + $0x38] sm:$0xff]  }
   0x7   :  { %2418 = vmatpush3.bf16.msra.mxu0 %v2539_v3  ;;  %v2552_v17 = vld [vmem:[%s4157_s0] ss:$8 sps:$4 sm:$0xff]   ;;  %v2555_v18 = vld [vmem:[%s4157_s0 + $0x14] ss:$8 sps:$4 sm:$0xff]   ;;  %v2557_v19 = vld [vmem:[%s4157_s0 + $0x10] ss:$8 sps:$4 sm:$0xff]  }
   0x8   :  { %2419 = vmatprep.subr.bf16.mxu0 %v2540_v4  ;;  %v2600_v20 = vld [vmem:[%s4162_s5 + $0x4] ss:$8 sps:$4 sm:$0xff]   ;;  %v2602_v21 = vld [vmem:[%s4162_s5] ss:$8 sps:$4 sm:$0xff]   ;;  %v2603_v23 = vld [vmem:[%s4162_s5 + $0x14] ss:$8 sps:$4 sm:$0xff]  }
   0x9   :  { %v2558_v22 = vld [vmem:[%s4157_s0 + $0x24] ss:$8 sps:$4 sm:$0xff]   ;;  %688 = vmatprep.subr.bf16.mxu1 %v2600_v20  ;;  %v2605_v24 = vld [vmem:[%s4162_s5 + $0x10] ss:$8 sps:$4 sm:$0xff]   ;;  %v2560_v26 = vld [vmem:[%s4157_s0 + $0x20] ss:$8 sps:$4 sm:$0xff]  }
   0xa   :  { %689 = vmatpush1.bf16.msra.mxu1 %v2602_v21  ;;  %v2606_v25 = vld [vmem:[%s4162_s5 + $0x24] ss:$8 sps:$4 sm:$0xff]   ;;  %v2608_v27 = vld [vmem:[%s4162_s5 + $0x20] ss:$8 sps:$4 sm:$0xff]   ;;  %v2561_v28 = vld [vmem:[%s4157_s0 + $0x34] ss:$8 sps:$4 sm:$0xff]  }
   0xb   :  { %2420 = vmatpush3.bf16.msra.mxu0 %v2541_v5  ;;  %690 = vmatprep.subr.bf16.mxu1 %v2603_v23  ;;  %v2609_v29 = vld [vmem:[%s4162_s5 + $0x34] ss:$8 sps:$4 sm:$0xff]   ;;  %v2611_v30 = vld [vmem:[%s4162_s5 + $0x30] ss:$8 sps:$4 sm:$0xff]   ;;  %v2612_v31 = vld [vmem:[%s4162_s5 + $0x44] ss:$8 sps:$4 sm:$0xff]  }
   0xc   :  { %2421 = vmatprep.subr.bf16.mxu0 %v2542_v6  ;;  %v2614_v32 = vld [vmem:[%s4162_s5 + $0x40] ss:$8 sps:$4 sm:$0xff]   ;;  %v2563_v33 = vld [vmem:[%s4157_s0 + $0x30] ss:$8 sps:$4 sm:$0xff]   ;;  %v2615_v34 = vld [vmem:[%s4162_s5 + $0x54] ss:$8 sps:$4 sm:$0xff]  }
   0xd   :  { %v2564_v35 = vld [vmem:[%s4157_s0 + $0x44] ss:$8 sps:$4 sm:$0xff]   ;;  %v2617_v36 = vld [vmem:[%s4162_s5 + $0x50] ss:$8 sps:$4 sm:$0xff]  }
   0xe   :  { %691 = vmatpush1.bf16.msra.mxu1 %v2605_v24 }
   0xf   :  { %2422 = vmatpush3.bf16.msra.mxu0 %v2543_v7  ;;  %692 = vmatprep.subr.bf16.mxu1 %v2606_v25 }
  0x10   :  { %2423 = vmatprep.subr.bf16.mxu0 %v2544_v8 }
  0x12   :  { %693 = vmatpush1.bf16.msra.mxu1 %v2608_v27 }
  0x13   :  { %2424 = vmatpush3.bf16.msra.mxu0 %v2545_v9  ;;  %694 = vmatprep.subr.bf16.mxu1 %v2609_v29 }
  0x14   :  { %2425 = vmatprep.subr.bf16.mxu0 %v2546_v10 }
  0x16   :  { %695 = vmatpush1.bf16.msra.mxu1 %v2611_v30 }
  0x17   :  { %2426 = vmatpush3.bf16.msra.mxu0 %v2547_v12  ;;  %696 = vmatprep.subr.bf16.mxu1 %v2612_v31 }
  0x18   :  { %2427 = vmatprep.subr.bf16.mxu0 %v2548_v13 }
  0x1a   :  { %697 = vmatpush1.bf16.msra.mxu1 %v2614_v32 }
  0x1b   :  { %2428 = vmatpush3.bf16.msra.mxu0 %v2549_v14 }
  0x1c   :  { %2429 = vmatprep.subr.bf16.mxu0 %v2550_v15 }
  0x1f   :  { %2430 = vmatpush3.bf16.msra.mxu0 %v2551_v16 }
  0x22   :  { %436 = vmatmul.mubr.bf16.vlgmr.msra.gmra.mrb[0].mxu0 %v2552_v17 }
  0x23   :  { %443 = vmatprep.mubr.bf16.mxu0 %v2555_v18 }
  0x2a   :  { %444 = vmatmul.mubr.bf16.gmra.mrb[4].mxu0 %v2557_v19 }
  0x2b   :  { %451 = vmatprep.mubr.bf16.mxu0 %v2558_v22 }
  0x32   :  { %452 = vmatmul.mubr.bf16.gmra.mrb[8].mxu0 %v2560_v26 }
  0x33   :  { %459 = vmatprep.mubr.bf16.mxu0 %v2561_v28 }
  0x34   :  { %20 = vsyncpa [#allocation9], 0  ;;  %698 = vmatprep.subr.bf16.mxu1 %v2615_v34  ;;  %v2566_v37 = vld [vmem:[%s4157_s0 + $0x40] ss:$8 sps:$4 sm:$0xff]   ;;  %v2567_v38 = vld [vmem:[%s4157_s0 + $0x54] ss:$8 sps:$4 sm:$0xff]  }
  0x35   :  { %699 = vmatpush1.bf16.msra.mxu1 %v2617_v36  ;;  %v2569_v39 = vld [vmem:[%s4157_s0 + $0x50] ss:$8 sps:$4 sm:$0xff]   ;;  %v2570_v40 = vld [vmem:[%s4157_s0 + $0x64] ss:$8 sps:$4 sm:$0xff]   ;;  %v2572_v41 = vld [vmem:[%s4157_s0 + $0x60] ss:$8 sps:$4 sm:$0xff]  }
  0x36   :  { %v2573_v42 = vld [vmem:[%s4157_s0 + $0x74] ss:$8 sps:$4 sm:$0xff]   ;;  %v2575_v43 = vld [vmem:[%s4157_s0 + $0x70] ss:$8 sps:$4 sm:$0xff]   ;;  %v2576_v44 = vld [vmem:[%s4157_s0 + $0x84] ss:$8 sps:$4 sm:$0xff]  }
  0x37   :  { %v2578_v45 = vld [vmem:[%s4157_s0 + $0x80] ss:$8 sps:$4 sm:$0xff]   ;;  %v2579_v46 = vld [vmem:[%s4157_s0 + $0x94] ss:$8 sps:$4 sm:$0xff]   ;;  %v2581_v47 = vld [vmem:[%s4157_s0 + $0x90] ss:$8 sps:$4 sm:$0xff]  }
  0x38   :  { %v2582_v48 = vld [vmem:[%s4157_s0 + $0xa4] ss:$8 sps:$4 sm:$0xff]   ;;  %v2584_v49 = vld [vmem:[%s4157_s0 + $0xa0] ss:$8 sps:$4 sm:$0xff]   ;;  %v2585_v50 = vld [vmem:[%s4157_s0 + $0xb4] ss:$8 sps:$4 sm:$0xff]  }
  0x39   :  { %v2618_v51 = vld [vmem:[%s4162_s5 + $0x64] ss:$8 sps:$4 sm:$0xff]   ;;  %v2587_v52 = vld [vmem:[%s4157_s0 + $0xb0] ss:$8 sps:$4 sm:$0xff]   ;;  %v2620_v53 = vld [vmem:[%s4162_s5 + $0x60] ss:$8 sps:$4 sm:$0xff]  }
  0x3a   :  { %460 = vmatmul.mubr.bf16.gmra.mrb[12].mxu0 %v2563_v33  ;;  %v2588_v54 = vld [vmem:[%s4157_s0 + $0xc4] ss:$8 sps:$4 sm:$0xff]   ;;  %700 = vmatprep.subr.bf16.mxu1 %v2618_v51  ;;  %v2621_v55 = vld [vmem:[%s4162_s5 + $0x74] ss:$8 sps:$4 sm:$0xff]   ;;  %v2623_v56 = vld [vmem:[%s4162_s5 + $0x70] ss:$8 sps:$4 sm:$0xff]  }
  0x3b   :  { %467 = vmatprep.mubr.bf16.mxu0 %v2564_v35  ;;  %701 = vmatpush1.bf16.msra.mxu1 %v2620_v53  ;;  %v2590_v57 = vld [vmem:[%s4157_s0 + $0xc0] ss:$8 sps:$4 sm:$0xff]   ;;  %v4172_v58 = vmov 0   ;;  %v2591_v59 = vld [vmem:[%s4157_s0 + $0xd4] ss:$8 sps:$4 sm:$0xff]  }
  0x3c   :  { %702 = vmatprep.subr.bf16.mxu1 %v2621_v55  ;;  %720 = vmatprep.mubr.bf16.mxu1 %v4172_v58  ;;  %v2593_v60 = vld [vmem:[%s4157_s0 + $0xd0] ss:$8 sps:$4 sm:$0xff]   ;;  %v2594_v61 = vld [vmem:[%s4157_s0 + $0xe4] ss:$8 sps:$4 sm:$0xff]   ;;  %v2596_v62 = vld [vmem:[%s4157_s0 + $0xe0] ss:$8 sps:$4 sm:$0xff]  }
  0x3d   :  { %v2597_v63 = vld [vmem:[%s4157_s0 + $0xf4] ss:$8 sps:$4 sm:$0xff]   ;;  %v2599_v0 = vld [vmem:[%s4157_s0 + $0xf0] ss:$8 sps:$4 sm:$0xff]   ;;  %v3229_v5 = vld [vmem:[%s4161_s4] ss:$0 sm:$0xff] }
  0x3f   :  { %703 = vmatpush1.bf16.msra.mxu1 %v2623_v56 }
  0x42   :  { %468 = vmatmul.mubr.bf16.gmra.mrb[16].mxu0 %v2566_v37 }
  0x43   :  { %475 = vmatprep.mubr.bf16.mxu0 %v2567_v38 }
  0x4a   :  { %476 = vmatmul.mubr.bf16.gmra.mrb[20].mxu0 %v2569_v39 }
  0x4b   :  { %483 = vmatprep.mubr.bf16.mxu0 %v2570_v40 }
  0x52   :  { %484 = vmatmul.mubr.bf16.gmra.mrb[24].mxu0 %v2572_v41 }
  0x53   :  { %491 = vmatprep.mubr.bf16.mxu0 %v2573_v42 }
  0x5a   :  { %492 = vmatmul.mubr.bf16.gmra.mrb[28].mxu0 %v2575_v43 }
  0x5b   :  { %499 = vmatprep.mubr.bf16.mxu0 %v2576_v44 }
  0x62   :  { %500 = vmatmul.mubr.bf16.gmra.mrb[32].mxu0 %v2578_v45 }
  0x63   :  { %507 = vmatprep.mubr.bf16.mxu0 %v2579_v46 }
  0x6a   :  { %508 = vmatmul.mubr.bf16.gmra.mrb[36].mxu0 %v2581_v47 }
  0x6b   :  { %515 = vmatprep.mubr.bf16.mxu0 %v2582_v48 }
  0x72   :  { %516 = vmatmul.mubr.bf16.gmra.mrb[40].mxu0 %v2584_v49 }
  0x73   :  { %523 = vmatprep.mubr.bf16.mxu0 %v2585_v50 }
  0x7a   :  { %524 = vmatmul.mubr.bf16.gmra.mrb[44].mxu0 %v2587_v52 }
  0x7b   :  { %531 = vmatprep.mubr.bf16.mxu0 %v2588_v54 }
  0x82   :  { %532 = vmatmul.mubr.bf16.gmra.mrb[48].mxu0 %v2590_v57 }
  0x83   :  { %539 = vmatprep.mubr.bf16.mxu0 %v2591_v59 }
  0x8a   :  { %540 = vmatmul.mubr.bf16.gmra.mrb[52].mxu0 %v2593_v60 }
  0x8b   :  { %547 = vmatprep.mubr.bf16.mxu0 %v2594_v61 }
  0x92   :  { %548 = vmatmul.mubr.bf16.gmra.mrb[56].mxu0 %v2596_v62 }
  0x93   :  { %555 = vmatprep.mubr.bf16.mxu0 %v2597_v63 }
  0x9a   :  { %556 = vmatmul.mubr.bf16.gmra.mrb[60].mxu0 %v2599_v0 }
  0x9b   :  { %1597 = vmatprep.mubr.bf16.mxu0 %v4172_v58 }
  0xf5   :  { %v2431_v1 = vpop.f32.mrb[0].mxu0 }
  0xf6   :  { %v2432_v2 = vpop.f32.mrb[1].mxu0 }
  0xf7   :  { %v2433_v3 = vadd.f32 %v2432_v2, %v2431_v1  ;;  %v2434_v4 = vpop.f32.mrb[2].mxu0 }
  0xf8   :  { %v2435_v6 = vpop.f32.mrb[3].mxu0 }
  0xf9   :  { %v2436_v7 = vadd.f32 %v2435_v6, %v2434_v4  ;;  %v438_v8 = vadd.f32 %v2433_v3, %v3229_v5 }
  0xfb   :  { %v441_v9 = vadd.f32 %v2436_v7, %v3229_v5 }
  0xfd   :  { %v2437_v10 = vpop.f32.mrb[4].mxu0  ;;  %v580_v11 = vpack.c.bf16 %v441_v9, %v438_v8 }
  0xfe   :  { %v2438_v12 = vpop.f32.mrb[5].mxu0 }
  0xff   :  { %v2439_v13 = vadd.f32 %v2438_v12, %v2437_v10  ;;  %v2440_v14 = vpop.f32.mrb[6].mxu0  ;;  %721 = vmatmul.mubr.bf16.vlgmr.msra.gmra.mrb[0].mxu1 %v580_v11 }
 0x100   :  { %v2441_v15 = vpop.f32.mrb[7].mxu0  ;;  %730 = vmatprep.mubr.bf16.mxu1 %v4172_v58 }
 0x101   :  { %v2442_v16 = vadd.f32 %v2441_v15, %v2440_v14  ;;  %v446_v17 = vadd.f32 %v2439_v13, %v3229_v5 }
 0x103   :  { %v449_v18 = vadd.f32 %v2442_v16, %v3229_v5 }
 0x105   :  { %v2443_v19 = vpop.f32.mrb[8].mxu0  ;;  %v581_v20 = vpack.c.bf16 %v449_v18, %v446_v17 }
 0x106   :  { %v2444_v21 = vpop.f32.mrb[9].mxu0 }
 0x107   :  { %v2445_v22 = vadd.f32 %v2444_v21, %v2443_v19  ;;  %v2446_v23 = vpop.f32.mrb[10].mxu0  ;;  %731 = vmatmul.mubr.bf16.gmra.mrb[4].mxu1 %v581_v20 }
 0x108   :  { %v2447_v24 = vpop.f32.mrb[11].mxu0  ;;  %740 = vmatprep.mubr.bf16.mxu1 %v4172_v58 }
 0x109   :  { %v454_v25 = vadd.f32 %v2445_v22, %v3229_v5  ;;  %v2448_v26 = vadd.f32 %v2447_v24, %v2446_v23 }
 0x10b   :  { %v457_v27 = vadd.f32 %v2448_v26, %v3229_v5 }
 0x10d   :  { %v2449_v28 = vpop.f32.mrb[12].mxu0  ;;  %v582_v29 = vpack.c.bf16 %v457_v27, %v454_v25 }
 0x10e   :  { %v2450_v30 = vpop.f32.mrb[13].mxu0 }
 0x10f   :  { %v2451_v31 = vadd.f32 %v2450_v30, %v2449_v28  ;;  %v2452_v32 = vpop.f32.mrb[14].mxu0  ;;  %741 = vmatmul.mubr.bf16.gmra.mrb[8].mxu1 %v582_v29 }
 0x110   :  { %v2453_v33 = vpop.f32.mrb[15].mxu0  ;;  %750 = vmatprep.mubr.bf16.mxu1 %v4172_v58 }
 0x111   :  { %v462_v34 = vadd.f32 %v2451_v31, %v3229_v5  ;;  %v2454_v35 = vadd.f32 %v2453_v33, %v2452_v32 }
 0x113   :  { %v465_v36 = vadd.f32 %v2454_v35, %v3229_v5 }
 0x115   :  { %v2455_v37 = vpop.f32.mrb[16].mxu0  ;;  %v583_v38 = vpack.c.bf16 %v465_v36, %v462_v34 }
 0x116   :  { %v2456_v39 = vpop.f32.mrb[17].mxu0 }
 0x117   :  { %v2457_v40 = vadd.f32 %v2456_v39, %v2455_v37  ;;  %v2458_v41 = vpop.f32.mrb[18].mxu0  ;;  %751 = vmatmul.mubr.bf16.gmra.mrb[12].mxu1 %v583_v38 }
 0x118   :  { %v2459_v42 = vpop.f32.mrb[19].mxu0  ;;  %760 = vmatprep.mubr.bf16.mxu1 %v4172_v58 }
 0x119   :  { %v470_v43 = vadd.f32 %v2457_v40, %v3229_v5  ;;  %v2460_v44 = vadd.f32 %v2459_v42, %v2458_v41 }
 0x11b   :  { %v473_v45 = vadd.f32 %v2460_v44, %v3229_v5 }
 0x11d   :  { %v2461_v46 = vpop.f32.mrb[20].mxu0  ;;  %v584_v47 = vpack.c.bf16 %v473_v45, %v470_v43 }
 0x11e   :  { %v2462_v48 = vpop.f32.mrb[21].mxu0 }
 0x11f   :  { %v2463_v49 = vadd.f32 %v2462_v48, %v2461_v46  ;;  %v2464_v50 = vpop.f32.mrb[22].mxu0  ;;  %761 = vmatmul.mubr.bf16.gmra.mrb[16].mxu1 %v584_v47 }
 0x120   :  { %v2465_v51 = vpop.f32.mrb[23].mxu0  ;;  %770 = vmatprep.mubr.bf16.mxu1 %v4172_v58 }
 0x121   :  { %v478_v52 = vadd.f32 %v2463_v49, %v3229_v5  ;;  %v2466_v53 = vadd.f32 %v2465_v51, %v2464_v50 }
 0x123   :  { %v481_v54 = vadd.f32 %v2466_v53, %v3229_v5 }
 0x125   :  { %v2467_v55 = vpop.f32.mrb[24].mxu0  ;;  %v585_v56 = vpack.c.bf16 %v481_v54, %v478_v52 }
 0x126   :  { %v2468_v57 = vpop.f32.mrb[25].mxu0 }
 0x127   :  { %v2469_v59 = vadd.f32 %v2468_v57, %v2467_v55  ;;  %v2470_v60 = vpop.f32.mrb[26].mxu0  ;;  %771 = vmatmul.mubr.bf16.gmra.mrb[20].mxu1 %v585_v56 }
 0x128   :  { %v2471_v61 = vpop.f32.mrb[27].mxu0  ;;  %780 = vmatprep.mubr.bf16.mxu1 %v4172_v58 }
 0x129   :  { %v486_v62 = vadd.f32 %v2469_v59, %v3229_v5  ;;  %v2472_v63 = vadd.f32 %v2471_v61, %v2470_v60 }
 0x12b   :  { %v489_v0 = vadd.f32 %v2472_v63, %v3229_v5 }
 0x12d   :  { %v2473_v1 = vpop.f32.mrb[28].mxu0  ;;  %v586_v2 = vpack.c.bf16 %v489_v0, %v486_v62 }
 0x12e   :  { %v2474_v3 = vpop.f32.mrb[29].mxu0 }
 0x12f   :  { %v2475_v4 = vadd.f32 %v2474_v3, %v2473_v1  ;;  %v2476_v6 = vpop.f32.mrb[30].mxu0  ;;  %781 = vmatmul.mubr.bf16.gmra.mrb[24].mxu1 %v586_v2 }
 0x130   :  { %v2477_v7 = vpop.f32.mrb[31].mxu0  ;;  %790 = vmatprep.mubr.bf16.mxu1 %v4172_v58 }
 0x131   :  { %v494_v8 = vadd.f32 %v2475_v4, %v3229_v5  ;;  %v2478_v9 = vadd.f32 %v2477_v7, %v2476_v6 }
 0x133   :  { %v497_v10 = vadd.f32 %v2478_v9, %v3229_v5 }
 0x135   :  { %v2479_v11 = vpop.f32.mrb[32].mxu0  ;;  %v587_v12 = vpack.c.bf16 %v497_v10, %v494_v8 }
 0x136   :  { %v2480_v13 = vpop.f32.mrb[33].mxu0 }
 0x137   :  { %v2481_v14 = vadd.f32 %v2480_v13, %v2479_v11  ;;  %v2482_v15 = vpop.f32.mrb[34].mxu0  ;;  %791 = vmatmul.mubr.bf16.gmra.mrb[28].mxu1 %v587_v12 }
 0x138   :  { %v2483_v16 = vpop.f32.mrb[35].mxu0  ;;  %800 = vmatprep.mubr.bf16.mxu1 %v4172_v58 }
 0x139   :  { %v502_v17 = vadd.f32 %v2481_v14, %v3229_v5  ;;  %v2484_v18 = vadd.f32 %v2483_v16, %v2482_v15 }
 0x13b   :  { %v505_v19 = vadd.f32 %v2484_v18, %v3229_v5 }
 0x13d   :  { %v2485_v20 = vpop.f32.mrb[36].mxu0  ;;  %v588_v21 = vpack.c.bf16 %v505_v19, %v502_v17 }
 0x13e   :  { %v2486_v22 = vpop.f32.mrb[37].mxu0 }
 0x13f   :  { %v2487_v23 = vadd.f32 %v2486_v22, %v2485_v20  ;;  %v2488_v24 = vpop.f32.mrb[38].mxu0  ;;  %801 = vmatmul.mubr.bf16.gmra.mrb[32].mxu1 %v588_v21  ;;  %v2624_v22 = vld [vmem:[%s4164_s7] ss:$8 sps:$4 sm:$0xff]  }
 0x140   :  { %v2489_v25 = vpop.f32.mrb[39].mxu0  ;;  %810 = vmatprep.mubr.bf16.mxu1 %v4172_v58 }
 0x141   :  { %v510_v26 = vadd.f32 %v2487_v23, %v3229_v5  ;;  %v2490_v27 = vadd.f32 %v2489_v25, %v2488_v24  ;;  %v2626_v23 = vld [vmem:[%s4164_s7 + $0x4] ss:$8 sps:$4 sm:$0xff]   ;;  %v2627_v24 = vld [vmem:[%s4159_s2] ss:$8 sps:$4 sm:$0xff]   ;;  %v2630_v25 = vld [vmem:[%s4164_s7 + $0x10] ss:$8 sps:$4 sm:$0xff]  }
 0x142   :  { %1565 = vmatprep.subr.bf16.mxu0 %v2626_v23 }
 0x143   :  { %v513_v28 = vadd.f32 %v2490_v27, %v3229_v5  ;;  %1566 = vmatpush1.bf16.msra.mxu0 %v2624_v22  ;;  %v2633_v27 = vld [vmem:[%s4159_s2 + $0x10] ss:$8 sps:$4 sm:$0xff]  }
 0x145   :  { %v2491_v29 = vpop.f32.mrb[40].mxu0  ;;  %v589_v30 = vpack.c.bf16 %v513_v28, %v510_v26  ;;  %v2632_v26 = vld [vmem:[%s4164_s7 + $0x14] ss:$8 sps:$4 sm:$0xff]  }
 0x146   :  { %v2492_v31 = vpop.f32.mrb[41].mxu0  ;;  %v2635_v28 = vld [vmem:[%s4159_s2 + $0x14] ss:$8 sps:$4 sm:$0xff]   ;;  %1567 = vmatprep.subr.bf16.mxu0 %v2632_v26 }
 0x147   :  { %v2493_v32 = vadd.f32 %v2492_v31, %v2491_v29  ;;  %v2494_v33 = vpop.f32.mrb[42].mxu0  ;;  %811 = vmatmul.mubr.bf16.gmra.mrb[36].mxu1 %v589_v30  ;;  %1568 = vmatpush1.bf16.msra.mxu0 %v2630_v25  ;;  %v2636_v29 = vld [vmem:[%s4164_s7 + $0x20] ss:$8 sps:$4 sm:$0xff]   ;;  %v2638_v30 = vld [vmem:[%s4164_s7 + $0x24] ss:$8 sps:$4 sm:$0xff]  }
 0x148   :  { %v2495_v34 = vpop.f32.mrb[43].mxu0  ;;  %820 = vmatprep.mubr.bf16.mxu1 %v4172_v58  ;;  %v2639_v31 = vld [vmem:[%s4159_s2 + $0x20] ss:$8 sps:$4 sm:$0xff]   ;;  %1569 = vmatprep.subr.bf16.mxu0 %v2638_v30 }
 0x149   :  { %v518_v35 = vadd.f32 %v2493_v32, %v3229_v5  ;;  %v2496_v36 = vadd.f32 %v2495_v34, %v2494_v33  ;;  %v2641_v32 = vld [vmem:[%s4159_s2 + $0x24] ss:$8 sps:$4 sm:$0xff]   ;;  %v598_v33 = vlaneseq  ;;  %v2642_v34 = vld [vmem:[%s4164_s7 + $0x30] ss:$8 sps:$4 sm:$0xff]  }
 0x14b   :  { %v521_v37 = vadd.f32 %v2496_v36, %v3229_v5  ;;  %1570 = vmatpush1.bf16.msra.mxu0 %v2636_v29  ;;  %v2645_v36 = vld [vmem:[%s4159_s2 + $0x30] ss:$8 sps:$4 sm:$0xff]  }
 0x14d   :  { %v2497_v38 = vpop.f32.mrb[44].mxu0  ;;  %v590_v39 = vpack.c.bf16 %v521_v37, %v518_v35  ;;  %v2644_v35 = vld [vmem:[%s4164_s7 + $0x34] ss:$8 sps:$4 sm:$0xff]  }
 0x14e   :  { %v2498_v40 = vpop.f32.mrb[45].mxu0  ;;  %v2647_v37 = vld [vmem:[%s4159_s2 + $0x34] ss:$8 sps:$4 sm:$0xff]   ;;  %1571 = vmatprep.subr.bf16.mxu0 %v2644_v35 }
 0x14f   :  { %v2499_v41 = vadd.f32 %v2498_v40, %v2497_v38  ;;  %v2500_v42 = vpop.f32.mrb[46].mxu0  ;;  %821 = vmatmul.mubr.bf16.gmra.mrb[40].mxu1 %v590_v39  ;;  %1572 = vmatpush1.bf16.msra.mxu0 %v2642_v34  ;;  %v3327_v38 = vshrl.u32 %v598_v33, 7  ;;  %v596_v40 = vld [vmem:[%s4163_s6] sm:$0x3]  ;;  %v2662_v34 = vld [vmem:[%s4164_s7 + $0x64] ss:$8 sps:$4 sm:$0xff]  }
 0x150   :  { %v2501_v43 = vpop.f32.mrb[47].mxu0  ;;  %830 = vmatprep.mubr.bf16.mxu1 %v4172_v58  ;;  %v2660_v33 = vld [vmem:[%s4164_s7 + $0x60] ss:$8 sps:$4 sm:$0xff]  }
 0x151   :  { %v526_v44 = vadd.f32 %v2499_v41, %v3229_v5  ;;  %v2502_v45 = vadd.f32 %v2501_v43, %v2500_v42  ;;  %4188 = vst [vmem:[#allocation13_spill] sm:$0xff] %v3327_v38  ;;  %v4170_v39 = vsub.s32 1, %v3327_v38 }
 0x153   :  { %v529_v46 = vadd.f32 %v2502_v45, %v3229_v5  ;;  %v3335_v41 = vrot.slane %v596_v40, %v4170_v39 }
 0x155   :  { %v2503_v47 = vpop.f32.mrb[48].mxu0  ;;  %v591_v48 = vpack.c.bf16 %v529_v46, %v526_v44  ;;  %v2648_v46 = vld [vmem:[%s4164_s7 + $0x40] ss:$8 sps:$4 sm:$0xff]  }
 0x156   :  { %v2504_v49 = vpop.f32.mrb[49].mxu0 }
 0x157   :  { %v2505_v50 = vadd.f32 %v2504_v49, %v2503_v47  ;;  %v2506_v51 = vpop.f32.mrb[50].mxu0  ;;  %831 = vmatmul.mubr.bf16.gmra.mrb[44].mxu1 %v591_v48  ;;  %v2650_v47 = vld [vmem:[%s4164_s7 + $0x44] ss:$8 sps:$4 sm:$0xff]   ;;  %v2651_v49 = vld [vmem:[%s4159_s2 + $0x40] ss:$8 sps:$4 sm:$0xff]  }
 0x158   :  { %v2507_v52 = vpop.f32.mrb[51].mxu0  ;;  %840 = vmatprep.mubr.bf16.mxu1 %v4172_v58  ;;  %1573 = vmatprep.subr.bf16.mxu0 %v2650_v47 }
 0x159   :  { %v534_v53 = vadd.f32 %v2505_v50, %v3229_v5  ;;  %v2508_v54 = vadd.f32 %v2507_v52, %v2506_v51  ;;  %v2653_v50 = vld [vmem:[%s4159_s2 + $0x44] ss:$8 sps:$4 sm:$0xff]   ;;  %1574 = vmatpush1.bf16.msra.mxu0 %v2648_v46 }
 0x15b   :  { %v537_v55 = vadd.f32 %v2508_v54, %v3229_v5 }
 0x15d   :  { %v2509_v56 = vpop.f32.mrb[52].mxu0  ;;  %v592_v57 = vpack.c.bf16 %v537_v55, %v534_v53 }
 0x15e   :  { %v2510_v59 = vpop.f32.mrb[53].mxu0 }
 0x15f   :  { %v2511_v60 = vadd.f32 %v2510_v59, %v2509_v56  ;;  %v2512_v61 = vpop.f32.mrb[54].mxu0  ;;  %841 = vmatmul.mubr.bf16.gmra.mrb[48].mxu1 %v592_v57  ;;  %v2654_v59 = vld [vmem:[%s4164_s7 + $0x50] ss:$8 sps:$4 sm:$0xff]  }
 0x160   :  { %v2513_v62 = vpop.f32.mrb[55].mxu0  ;;  %850 = vmatprep.mubr.bf16.mxu1 %v4172_v58 }
 0x161   :  { %v542_v63 = vadd.f32 %v2511_v60, %v3229_v5  ;;  %v2514_v0 = vadd.f32 %v2513_v62, %v2512_v61  ;;  %v2656_v60 = vld [vmem:[%s4164_s7 + $0x54] ss:$8 sps:$4 sm:$0xff]  }
 0x162   :  { %1575 = vmatprep.subr.bf16.mxu0 %v2656_v60 }
 0x163   :  { %v545_v1 = vadd.f32 %v2514_v0, %v3229_v5  ;;  %1576 = vmatpush1.bf16.msra.mxu0 %v2654_v59 }
 0x164   :  { %1577 = vmatprep.subr.bf16.mxu0 %v2662_v34 }
 0x165   :  { %v2515_v2 = vpop.f32.mrb[56].mxu0  ;;  %v593_v3 = vpack.c.bf16 %v545_v1, %v542_v63  ;;  %v4171_v63 = vsub.s32 0, %v3327_v38  ;;  %v2657_v1 = vld [vmem:[%s4159_s2 + $0x50] ss:$8 sps:$4 sm:$0xff]  }
 0x166   :  { %v2516_v4 = vpop.f32.mrb[57].mxu0 }
 0x167   :  { %v2517_v6 = vadd.f32 %v2516_v4, %v2515_v2  ;;  %v2518_v7 = vpop.f32.mrb[58].mxu0  ;;  %851 = vmatmul.mubr.bf16.gmra.mrb[52].mxu1 %v593_v3  ;;  %v2659_v2 = vld [vmem:[%s4159_s2 + $0x54] ss:$8 sps:$4 sm:$0xff]   ;;  %1578 = vmatpush1.bf16.msra.mxu0 %v2660_v33 }
 0x168   :  { %v2519_v8 = vpop.f32.mrb[59].mxu0  ;;  %860 = vmatprep.mubr.bf16.mxu1 %v4172_v58 }
 0x169   :  { %v550_v9 = vadd.f32 %v2517_v6, %v3229_v5  ;;  %v2520_v10 = vadd.f32 %v2519_v8, %v2518_v7  ;;  %v3370_v8 = vrot.slane %v596_v40, %v4171_v63  ;;  %v79_v40 = vld [vmem:[%s4158_s1 + $0x18] sm:$0xff] }
 0x16b   :  { %v553_v11 = vadd.f32 %v2520_v10, %v3229_v5 }
 0x16d   :  { %v2521_v12 = vpop.f32.mrb[60].mxu0  ;;  %v594_v13 = vpack.c.bf16 %v553_v11, %v550_v9  ;;  %v76_v11 = vld [vmem:[%s4158_s1] sm:$0xff] }
 0x16e   :  { %v2522_v14 = vpop.f32.mrb[61].mxu0 }
 0x16f   :  { %v2523_v15 = vadd.f32 %v2522_v14, %v2521_v12  ;;  %v2524_v16 = vpop.f32.mrb[62].mxu0  ;;  %861 = vmatmul.mubr.bf16.gmra.mrb[56].mxu1 %v594_v13 }
 0x170   :  { %v2525_v17 = vpop.f32.mrb[63].mxu0  ;;  %870 = vmatprep.mubr.bf16.mxu1 %v4172_v58 }
 0x171   :  { %v558_v18 = vadd.f32 %v2523_v15, %v3229_v5  ;;  %v2526_v19 = vadd.f32 %v2525_v17, %v2524_v16  ;;  %v77_v16 = vld [vmem:[%s4158_s1 + $0x8] sm:$0xff] }
 0x173   :  { %v561_v20 = vadd.f32 %v2526_v19, %v3229_v5  ;;  %v2629_v5 = vld [vmem:[%s4159_s2 + $0x4] ss:$8 sps:$4 sm:$0xff]  }
 0x174   :  { %1998 = vmatprep.subr.bf16.mxu1 %v2629_v5 }
 0x175   :  { %v595_v21 = vpack.c.bf16 %v561_v20, %v558_v18  ;;  %1999 = vmatpush1.bf16.msra.mxu1 %v2627_v24 }
 0x176   :  { %2000 = vmatprep.subr.bf16.mxu1 %v2635_v28 }
 0x177   :  { %871 = vmatmul.mubr.bf16.gmra.mrb[60].mxu1 %v595_v21 }
 0x178   :  { %2030 = vmatprep.mubr.bf16.mxu1 %v4172_v58 }
 0x179   :  { %2001 = vmatpush1.bf16.msra.mxu1 %v2633_v27 }
 0x17a   :  { %2002 = vmatprep.subr.bf16.mxu1 %v2641_v32 }
 0x17d   :  { %2003 = vmatpush1.bf16.msra.mxu1 %v2639_v31  ;;  %v78_v31 = vld [vmem:[%s4158_s1 + $0x10] sm:$0xff] }
 0x17e   :  { %2004 = vmatprep.subr.bf16.mxu1 %v2647_v37 }
 0x181   :  { %2005 = vmatpush1.bf16.msra.mxu1 %v2645_v36 }
 0x182   :  { %2006 = vmatprep.subr.bf16.mxu1 %v2653_v50 }
 0x185   :  { %2007 = vmatpush1.bf16.msra.mxu1 %v2651_v49 }
 0x186   :  { %2008 = vmatprep.subr.bf16.mxu1 %v2659_v2 }
 0x189   :  { %2009 = vmatpush1.bf16.msra.mxu1 %v2657_v1 }
 0x1d2   :  { %v722_v42 = vpop.f32.mrb[0].mxu1 }
 0x1d3   :  { %v724_v43 = vpop.f32.mrb[1].mxu1  ;;  %v3384_v17 = vadd.f32 %v722_v42, %v3370_v8 }
 0x1d4   :  { %v725_v44 = vadd.f32 %v724_v43, %v3335_v41  ;;  %v726_v45 = vpop.f32.mrb[2].mxu1 }
 0x1d5   :  { %v728_v48 = vpop.f32.mrb[3].mxu1  ;;  %v3388_v23 = vadd.f32 %v726_v45, %v3370_v8 }
 0x1d6   :  { %v881_v51 = vmul.f32 0.5, %v725_v44  ;;  %1854 = vst [vmem:[#allocation8] sm:$0xff] %v725_v44  ;;  %v729_v52 = vadd.f32 %v728_v48, %v3335_v41 }
 0x1d8   :  { %v913_v53 = vmul.f32 1.442695, %v881_v51  ;;  %v882_v54 = vmul.f32 0.5, %v729_v52  ;;  %1855 = vst [vmem:[#allocation8 + $0x8] sm:$0xff] %v729_v52  ;;  %v2663_v52 = vld [vmem:[%s4159_s2 + $0x60] ss:$8 sps:$4 sm:$0xff]  }
 0x1da   :  { %2672 = vpow2.f32 %v913_v53  ;;  %v915_v55 = vmul.f32 1.442695, %v882_v54  ;;  %v732_v56 = vpop.f32.mrb[4].mxu1  ;;  %v2665_v53 = vld [vmem:[%s4159_s2 + $0x64] ss:$8 sps:$4 sm:$0xff]  }
 0x1db   :  { %v734_v57 = vpop.f32.mrb[5].mxu1  ;;  %v3416_v42 = vadd.f32 %v732_v56, %v3370_v8  ;;  %2010 = vmatprep.subr.bf16.mxu1 %v2665_v53 }
 0x1dc   :  { %2674 = vpow2.f32 %v915_v55  ;;  %v735_v61 = vadd.f32 %v734_v57, %v3335_v41  ;;  %v3358_v62 = vpop.f32.mrb[6].mxu1  ;;  %2011 = vmatpush1.bf16.msra.mxu1 %v2663_v52 }
 0x1dd   :  { %v738_v0 = vpop.f32.mrb[7].mxu1  ;;  %v3423_v49 = vadd.f32 %v3358_v62, %v3370_v8 }
 0x1de   :  { %v883_v3 = vmul.f32 0.5, %v735_v61  ;;  %1856 = vst [vmem:[#allocation8 + $0x10] sm:$0xff] %v735_v61  ;;  %v739_v4 = vadd.f32 %v738_v0, %v3335_v41  ;;  %v80_v61 = vld [vmem:[%s4158_s1 + $0x20] sm:$0xff] }
 0x1e0   :  { %v917_v6 = vmul.f32 1.442695, %v883_v3  ;;  %v884_v7 = vmul.f32 0.5, %v739_v4  ;;  %1857 = vst [vmem:[#allocation8 + $0x18] sm:$0xff] %v739_v4  ;;  %v81_v3 = vld [vmem:[%s4158_s1 + $0x28] sm:$0xff] }
 0x1e2   :  { %2676 = vpow2.f32 %v917_v6  ;;  %v919_v9 = vmul.f32 1.442695, %v884_v7  ;;  %v3372_v10 = vpop.f32.mrb[8].mxu1 }
 0x1e3   :  { %v744_v12 = vpop.f32.mrb[9].mxu1  ;;  %v3452_v4 = vadd.f32 %v3372_v10, %v3370_v8 }
 0x1e4   :  { %v2673_v13 = vpop.eup %2672  ;;  %2678 = vpow2.f32 %v919_v9  ;;  %v745_v14 = vadd.f32 %v744_v12, %v3335_v41  ;;  %v3378_v15 = vpop.f32.mrb[10].mxu1 }
 0x1e5   :  { %v748_v18 = vpop.f32.mrb[11].mxu1  ;;  %v977_v19 = vmul.f32 %v2673_v13, %v76_v11 }
 0x1e6   :  { %v2675_v20 = vpop.eup %2674  ;;  %v885_v21 = vmul.f32 0.5, %v745_v14  ;;  %1858 = vst [vmem:[#allocation8 + $0x20] sm:$0xff] %v745_v14  ;;  %v749_v22 = vadd.f32 %v748_v18, %v3335_v41  ;;  %v3459_v14 = vadd.f32 %v3378_v15, %v3370_v8  ;;  %v82_v15 = vld [vmem:[%s4158_s1 + $0x30] sm:$0xff] }
 0x1e7   :  { %v3391_v24 = vadd.f32 %v977_v19, %v3384_v17  ;;  %v978_v5 = vmul.f32 %v2675_v20, %v77_v16 }
 0x1e8   :  { %v921_v25 = vmul.f32 1.442695, %v885_v21  ;;  %v886_v26 = vmul.f32 0.5, %v749_v22  ;;  %1859 = vst [vmem:[#allocation8 + $0x28] sm:$0xff] %v749_v22 }
 0x1e9   :  { %v1041_v27 = vmul.f32 %v3391_v24, %v3391_v24  ;;  %v3396_v28 = vadd.f32 %v978_v5, %v3388_v23 }
 0x1ea   :  { %2680 = vpow2.f32 %v921_v25  ;;  %v923_v29 = vmul.f32 1.442695, %v886_v26  ;;  %v3398_v30 = vpop.f32.mrb[12].mxu1 }
 0x1eb   :  { %v754_v32 = vpop.f32.mrb[13].mxu1  ;;  %1073 = vadd.xlane.f32.xlu0 %v1041_v27  ;;  %v1042_v44 = vmul.f32 %v3396_v28, %v3396_v28  ;;  %v3484_v33 = vadd.f32 %v3398_v30, %v3370_v8 }
 0x1ec   :  { %v2677_v35 = vpop.eup %2676  ;;  %2682 = vpow2.f32 %v923_v29  ;;  %v755_v36 = vadd.f32 %v754_v32, %v3335_v41  ;;  %v3410_v37 = vpop.f32.mrb[14].mxu1  ;;  %v83_v32 = vld [vmem:[%s4158_s1 + $0x38] sm:$0xff] }
 0x1ed   :  { %v758_v43 = vpop.f32.mrb[15].mxu1  ;;  %v979_v45 = vmul.f32 %v2677_v35, %v78_v31 }
 0x1ee   :  { %v2679_v46 = vpop.eup %2678  ;;  %v887_v47 = vmul.f32 0.5, %v755_v36  ;;  %1860 = vst [vmem:[#allocation8 + $0x30] sm:$0xff] %v755_v36  ;;  %v759_v48 = vadd.f32 %v758_v43, %v3335_v41 }
 0x1ef   :  { %1075 = vadd.xlane.f32.xlu0 %v1042_v44  ;;  %v3426_v50 = vadd.f32 %v979_v45, %v3416_v42  ;;  %v980_v51 = vmul.f32 %v2679_v46, %v79_v40  ;;  %v3489_v44 = vadd.f32 %v3410_v37, %v3370_v8  ;;  %v84_v37 = vld [vmem:[%s4158_s1 + $0x40] sm:$0xff] }
 0x1f0   :  { %v925_v54 = vmul.f32 1.442695, %v887_v47  ;;  %v888_v55 = vmul.f32 0.5, %v759_v48  ;;  %1861 = vst [vmem:[#allocation8 + $0x38] sm:$0xff] %v759_v48 }
 0x1f1   :  { %v1043_v56 = vmul.f32 %v3426_v50, %v3426_v50  ;;  %v3437_v57 = vadd.f32 %v980_v51, %v3423_v49 }
 0x1f2   :  { %2684 = vpow2.f32 %v925_v54  ;;  %v927_v59 = vmul.f32 1.442695, %v888_v55  ;;  %v3439_v60 = vpop.f32.mrb[16].mxu1 }
 0x1f3   :  { %v764_v62 = vpop.f32.mrb[17].mxu1  ;;  %1077 = vadd.xlane.f32.xlu1 %v1043_v56  ;;  %v1044_v7 = vmul.f32 %v3437_v57, %v3437_v57 }
 0x1f4   :  { %v2681_v0 = vpop.eup %2680  ;;  %2686 = vpow2.f32 %v927_v59  ;;  %v765_v1 = vadd.f32 %v764_v62, %v3335_v41  ;;  %v3445_v2 = vpop.f32.mrb[18].mxu1  ;;  %v85_v62 = vld [vmem:[%s4158_s1 + $0x48] sm:$0xff] }
 0x1f5   :  { %v768_v6 = vpop.f32.mrb[19].mxu1  ;;  %v981_v9 = vmul.f32 %v2681_v0, %v80_v61  ;;  %v3514_v0 = vadd.f32 %v3439_v60, %v3370_v8  ;;  %v2668_v60 = vld [vmem:[%s4164_s7 + $0x74] ss:$8 sps:$4 sm:$0xff]  }
 0x1f6   :  { %v2683_v11 = vpop.eup %2682  ;;  %v889_v12 = vmul.f32 0.5, %v765_v1  ;;  %1862 = vst [vmem:[#allocation8 + $0x40] sm:$0xff] %v765_v1  ;;  %v769_v13 = vadd.f32 %v768_v6, %v3335_v41  ;;  %1579 = vmatprep.subr.bf16.mxu0 %v2668_v60 }
 0x1f7   :  { %1079 = vadd.xlane.f32.xlu1 %v1044_v7  ;;  %v3462_v16 = vadd.f32 %v981_v9, %v3452_v4  ;;  %v982_v10 = vmul.f32 %v2683_v11, %v81_v3  ;;  %v3519_v11 = vadd.f32 %v3445_v2, %v3370_v8  ;;  %v2666_v2 = vld [vmem:[%s4164_s7 + $0x70] ss:$8 sps:$4 sm:$0xff]  }
 0x1f8   :  { %v929_v18 = vmul.f32 1.442695, %v889_v12  ;;  %v890_v19 = vmul.f32 0.5, %v769_v13  ;;  %1863 = vst [vmem:[#allocation8 + $0x48] sm:$0xff] %v769_v13  ;;  %1580 = vmatpush1.bf16.msra.mxu0 %v2666_v2 }
 0x1f9   :  { %v1045_v20 = vmul.f32 %v3462_v16, %v3462_v16  ;;  %v3467_v21 = vadd.f32 %v982_v10, %v3459_v14 }
 0x1fa   :  { %2688 = vpow2.f32 %v929_v18  ;;  %v931_v22 = vmul.f32 1.442695, %v890_v19  ;;  %v3469_v5 = vpop.f32.mrb[20].mxu1 }
 0x1fb   :  { %v774_v25 = vpop.f32.mrb[21].mxu1  ;;  %1081 = vadd.xlane.f32.xlu0 %v1045_v20  ;;  %v1046_v26 = vmul.f32 %v3467_v21, %v3467_v21 }
 0x1fc   :  { %v2685_v27 = vpop.eup %2684  ;;  %2690 = vpow2.f32 %v931_v22  ;;  %v775_v29 = vadd.f32 %v774_v25, %v3335_v41  ;;  %v3477_v31 = vpop.f32.mrb[22].mxu1  ;;  %v2669_v22 = vld [vmem:[%s4159_s2 + $0x70] ss:$8 sps:$4 sm:$0xff]  }
 0x1fd   :  { %v778_v34 = vpop.f32.mrb[23].mxu1  ;;  %1083 = vadd.xlane.f32.xlu1 %v1046_v26  ;;  %v983_v35 = vmul.f32 %v2685_v27, %v82_v15  ;;  %v2671_v15 = vld [vmem:[%s4159_s2 + $0x74] ss:$8 sps:$4 sm:$0xff]  }
 0x1fe   :  { %v2687_v36 = vpop.eup %2686  ;;  %v891_v40 = vmul.f32 0.5, %v775_v29  ;;  %1864 = vst [vmem:[#allocation8 + $0x50] sm:$0xff] %v775_v29  ;;  %v779_v43 = vadd.f32 %v778_v34, %v3335_v41  ;;  %v86_v27 = vld [vmem:[%s4158_s1 + $0x50] sm:$0xff]  ;;  %2012 = vmatprep.subr.bf16.mxu1 %v2671_v15 }
 0x1ff   :  { %v3492_v45 = vadd.f32 %v983_v35, %v3484_v33  ;;  %v984_v46 = vmul.f32 %v2687_v36, %v83_v32  ;;  %2013 = vmatpush1.bf16.msra.mxu1 %v2669_v22 }
 0x200   :  { %v933_v47 = vmul.f32 1.442695, %v891_v40  ;;  %v892_v48 = vmul.f32 0.5, %v779_v43  ;;  %1865 = vst [vmem:[#allocation8 + $0x58] sm:$0xff] %v779_v43  ;;  %v87_v40 = vld [vmem:[%s4158_s1 + $0x58] sm:$0xff]  ;;  %v3556_v43 = vadd.f32 %v3469_v5, %v3370_v8 }
 0x201   :  { %v1047_v30 = vmul.f32 %v3492_v45, %v3492_v45  ;;  %v3497_v51 = vadd.f32 %v984_v46, %v3489_v44 }
 0x202   :  { %2692 = vpow2.f32 %v933_v47  ;;  %v935_v52 = vmul.f32 1.442695, %v892_v48  ;;  %v3499_v53 = vpop.f32.mrb[24].mxu1 }
 0x203   :  { %v784_v54 = vpop.f32.mrb[25].mxu1  ;;  %1085 = vadd.xlane.f32.xlu0 %v1047_v30  ;;  %v1048_v55 = vmul.f32 %v3497_v51, %v3497_v51  ;;  %v3586_v60 = vadd.f32 %v3499_v53, %v3370_v8 }
 0x204   :  { %v2689_v56 = vpop.eup %2688  ;;  %2694 = vpow2.f32 %v935_v52  ;;  %v785_v59 = vadd.f32 %v784_v54, %v3335_v41  ;;  %v3507_v61 = vpop.f32.mrb[26].mxu1 }
 0x205   :  { %v788_v1 = vpop.f32.mrb[27].mxu1  ;;  %1087 = vadd.xlane.f32.xlu1 %v1048_v55  ;;  %v985_v3 = vmul.f32 %v2689_v56, %v84_v37  ;;  %v3561_v37 = vadd.f32 %v3477_v31, %v3370_v8  ;;  %v88_v31 = vld [vmem:[%s4158_s1 + $0x60] sm:$0xff] }
 0x206   :  { %v2691_v6 = vpop.eup %2690  ;;  %v893_v7 = vmul.f32 0.5, %v785_v59  ;;  %1866 = vst [vmem:[#allocation8 + $0x60] sm:$0xff] %v785_v59  ;;  %v789_v9 = vadd.f32 %v788_v1, %v3335_v41 }
 0x207   :  { %v3522_v12 = vadd.f32 %v985_v3, %v3514_v0  ;;  %v986_v13 = vmul.f32 %v2691_v6, %v85_v62 }
 0x208   :  { %v937_v10 = vmul.f32 1.442695, %v893_v7  ;;  %v894_v18 = vmul.f32 0.5, %v789_v9  ;;  %1867 = vst [vmem:[#allocation8 + $0x68] sm:$0xff] %v789_v9 }
 0x209   :  { %v1049_v19 = vmul.f32 %v3522_v12, %v3522_v12  ;;  %v3530_v20 = vadd.f32 %v986_v13, %v3519_v11 }
 0x20a   :  { %2696 = vpow2.f32 %v937_v10  ;;  %v939_v25 = vmul.f32 1.442695, %v894_v18  ;;  %v3541_v26 = vpop.f32.mrb[28].mxu1  ;;  %v89_v18 = vld [vmem:[%s4158_s1 + $0x68] sm:$0xff] }
 0x20b   :  { %v794_v29 = vpop.f32.mrb[29].mxu1  ;;  %1089 = vadd.xlane.f32.xlu0 %v1049_v19  ;;  %v1050_v32 = vmul.f32 %v3530_v20, %v3530_v20 }
 0x20c   :  { %v2693_v34 = vpop.eup %2692  ;;  %2698 = vpow2.f32 %v939_v25  ;;  %v795_v35 = vadd.f32 %v794_v29, %v3335_v41  ;;  %v3549_v36 = vpop.f32.mrb[30].mxu1 }
 0x20d   :  { %v798_v46 = vpop.f32.mrb[31].mxu1  ;;  %1091 = vadd.xlane.f32.xlu1 %v1050_v32  ;;  %v987_v47 = vmul.f32 %v2693_v34, %v86_v27  ;;  %v3591_v27 = vadd.f32 %v3507_v61, %v3370_v8  ;;  %v90_v61 = vld [vmem:[%s4158_s1 + $0x70] sm:$0xff] }
 0x20e   :  { %v2695_v48 = vpop.eup %2694  ;;  %v895_v30 = vmul.f32 0.5, %v795_v35  ;;  %1868 = vst [vmem:[#allocation8 + $0x70] sm:$0xff] %v795_v35  ;;  %v799_v52 = vadd.f32 %v798_v46, %v3335_v41 }
 0x20f   :  { %v3564_v54 = vadd.f32 %v987_v47, %v3556_v43  ;;  %v988_v55 = vmul.f32 %v2695_v48, %v87_v40 }
 0x210   :  { %v941_v56 = vmul.f32 1.442695, %v895_v30  ;;  %v896_v5 = vmul.f32 0.5, %v799_v52  ;;  %1869 = vst [vmem:[#allocation8 + $0x78] sm:$0xff] %v799_v52 }
 0x211   :  { %v1051_v59 = vmul.f32 %v3564_v54, %v3564_v54  ;;  %v3569_v62 = vadd.f32 %v988_v55, %v3561_v37 }
 0x212   :  { %2700 = vpow2.f32 %v941_v56  ;;  %v943_v1 = vmul.f32 1.442695, %v896_v5  ;;  %v3571_v3 = vpop.f32.mrb[32].mxu1  ;;  %v91_v5 = vld [vmem:[%s4158_s1 + $0x78] sm:$0xff] }
 0x213   :  { %v804_v6 = vpop.f32.mrb[33].mxu1  ;;  %1093 = vadd.xlane.f32.xlu0 %v1051_v59  ;;  %v1052_v7 = vmul.f32 %v3569_v62, %v3569_v62  ;;  %v3616_v59 = vadd.f32 %v3541_v26, %v3370_v8 }
 0x214   :  { %v2697_v9 = vpop.eup %2696  ;;  %2702 = vpow2.f32 %v943_v1  ;;  %v805_v13 = vadd.f32 %v804_v6, %v3335_v41  ;;  %v3579_v10 = vpop.f32.mrb[34].mxu1 }
 0x215   :  { %v808_v19 = vpop.f32.mrb[35].mxu1  ;;  %1095 = vadd.xlane.f32.xlu1 %v1052_v7  ;;  %v989_v2 = vmul.f32 %v2697_v9, %v88_v31 }
 0x216   :  { %v2699_v22 = vpop.eup %2698  ;;  %v897_v15 = vmul.f32 0.5, %v805_v13  ;;  %1870 = vst [vmem:[#allocation8 + $0x80] sm:$0xff] %v805_v13  ;;  %v809_v25 = vadd.f32 %v808_v19, %v3335_v41  ;;  %v3621_v13 = vadd.f32 %v3549_v36, %v3370_v8  ;;  %v92_v36 = vld [vmem:[%s4158_s1 + $0x80] sm:$0xff] }
 0x217   :  { %v3594_v29 = vadd.f32 %v989_v2, %v3586_v60  ;;  %v990_v32 = vmul.f32 %v2699_v22, %v89_v18 }
 0x218   :  { %v945_v34 = vmul.f32 1.442695, %v897_v15  ;;  %v898_v35 = vmul.f32 0.5, %v809_v25  ;;  %1871 = vst [vmem:[#allocation8 + $0x88] sm:$0xff] %v809_v25 }
 0x219   :  { %v1053_v53 = vmul.f32 %v3594_v29, %v3594_v29  ;;  %v3599_v40 = vadd.f32 %v990_v32, %v3591_v27 }
 0x21a   :  { %2704 = vpow2.f32 %v945_v34  ;;  %v947_v46 = vmul.f32 1.442695, %v898_v35  ;;  %v3601_v47 = vpop.f32.mrb[36].mxu1 }
 0x21b   :  { %v814_v48 = vpop.f32.mrb[37].mxu1  ;;  %1097 = vadd.xlane.f32.xlu0 %v1053_v53  ;;  %v1054_v30 = vmul.f32 %v3599_v40, %v3599_v40 }
 0x21c   :  { %v2701_v52 = vpop.eup %2700  ;;  %2706 = vpow2.f32 %v947_v46  ;;  %v815_v55 = vadd.f32 %v814_v48, %v3335_v41  ;;  %v3609_v56 = vpop.f32.mrb[38].mxu1  ;;  %v93_v48 = vld [vmem:[%s4158_s1 + $0x88] sm:$0xff] }
 0x21d   :  { %v818_v1 = vpop.f32.mrb[39].mxu1  ;;  %1099 = vadd.xlane.f32.xlu1 %v1054_v30  ;;  %v991_v31 = vmul.f32 %v2701_v52, %v90_v61  ;;  %v3646_v30 = vadd.f32 %v3571_v3, %v3370_v8 }
 0x21e   :  { %v2703_v6 = vpop.eup %2702  ;;  %v899_v7 = vmul.f32 0.5, %v815_v55  ;;  %1872 = vst [vmem:[#allocation8 + $0x90] sm:$0xff] %v815_v55  ;;  %v819_v9 = vadd.f32 %v818_v1, %v3335_v41 }
 0x21f   :  { %v3624_v18 = vadd.f32 %v991_v31, %v3616_v59  ;;  %v992_v19 = vmul.f32 %v2703_v6, %v91_v5  ;;  %v3651_v6 = vadd.f32 %v3579_v10, %v3370_v8  ;;  %v94_v10 = vld [vmem:[%s4158_s1 + $0x90] sm:$0xff] }
 0x220   :  { %v949_v2 = vmul.f32 1.442695, %v899_v7  ;;  %v900_v22 = vmul.f32 0.5, %v819_v9  ;;  %1873 = vst [vmem:[#allocation8 + $0x98] sm:$0xff] %v819_v9 }
 0x221   :  { %4189 = vst [vmem:[#allocation14_spill] sm:$0xff] %v3624_v18  ;;  %v1055_v26 = vmul.f32 %v3624_v18, %v3624_v18  ;;  %v3629_v15 = vadd.f32 %v992_v19, %v3621_v13 }
 0x222   :  { %2708 = vpow2.f32 %v949_v2  ;;  %v951_v25 = vmul.f32 1.442695, %v900_v22  ;;  %v3631_v32 = vpop.f32.mrb[40].mxu1 }
 0x223   :  { %4190 = vst [vmem:[#allocation15_spill] sm:$0xff] %v3629_v15  ;;  %v824_v34 = vpop.f32.mrb[41].mxu1  ;;  %1101 = vadd.xlane.f32.xlu0 %v1055_v26  ;;  %v1056_v35 = vmul.f32 %v3629_v15, %v3629_v15 }
 0x224   :  { %v2705_v53 = vpop.eup %2704  ;;  %2710 = vpow2.f32 %v951_v25  ;;  %v825_v46 = vadd.f32 %v824_v34, %v3335_v41  ;;  %v3639_v61 = vpop.f32.mrb[42].mxu1 }
 0x225   :  { %v828_v52 = vpop.f32.mrb[43].mxu1  ;;  %1103 = vadd.xlane.f32.xlu1 %v1056_v35  ;;  %v993_v55 = vmul.f32 %v2705_v53, %v92_v36 }
 0x226   :  { %v2707_v5 = vpop.eup %2706  ;;  %v901_v1 = vmul.f32 0.5, %v825_v46  ;;  %1874 = vst [vmem:[#allocation8 + $0xa0] sm:$0xff] %v825_v46  ;;  %v829_v31 = vadd.f32 %v828_v52, %v3335_v41  ;;  %v3676_v52 = vadd.f32 %v3601_v47, %v3370_v8 }
 0x227   :  { %v3654_v7 = vadd.f32 %v993_v55, %v3646_v30  ;;  %v994_v9 = vmul.f32 %v2707_v5, %v93_v48  ;;  %v95_v48 = vld [vmem:[%s4158_s1 + $0x98] sm:$0xff] }
 0x228   :  { %v953_v19 = vmul.f32 1.442695, %v901_v1  ;;  %v902_v2 = vmul.f32 0.5, %v829_v31  ;;  %1875 = vst [vmem:[#allocation8 + $0xa8] sm:$0xff] %v829_v31 }
 0x229   :  { %4191 = vst [vmem:[#allocation16_spill] sm:$0xff] %v3654_v7  ;;  %v1057_v3 = vmul.f32 %v3654_v7, %v3654_v7  ;;  %v3659_v22 = vadd.f32 %v994_v9, %v3651_v6 }
 0x22a   :  { %2712 = vpow2.f32 %v953_v19  ;;  %v955_v26 = vmul.f32 1.442695, %v902_v2  ;;  %v3661_v25 = vpop.f32.mrb[44].mxu1  ;;  %v3681_v19 = vadd.f32 %v3609_v56, %v3370_v8  ;;  %v96_v56 = vld [vmem:[%s4158_s1 + $0xa0] sm:$0xff] }
 0x22b   :  { %4192 = vst [vmem:[#allocation17_spill] sm:$0xff] %v3659_v22  ;;  %v834_v36 = vpop.f32.mrb[45].mxu1  ;;  %1105 = vadd.xlane.f32.xlu0 %v1057_v3  ;;  %v1058_v34 = vmul.f32 %v3659_v22, %v3659_v22 }
 0x22c   :  { %v2709_v35 = vpop.eup %2708  ;;  %2714 = vpow2.f32 %v955_v26  ;;  %v835_v53 = vadd.f32 %v834_v36, %v3335_v41  ;;  %v3669_v46 = vpop.f32.mrb[46].mxu1 }
 0x22d   :  { %v838_v55 = vpop.f32.mrb[47].mxu1  ;;  %1107 = vadd.xlane.f32.xlu1 %v1058_v34  ;;  %v995_v5 = vmul.f32 %v2709_v35, %v94_v10 }
 0x22e   :  { %v2711_v1 = vpop.eup %2710  ;;  %v903_v31 = vmul.f32 0.5, %v835_v53  ;;  %1876 = vst [vmem:[#allocation8 + $0xb0] sm:$0xff] %v835_v53  ;;  %v839_v9 = vadd.f32 %v838_v55, %v3335_v41 }
 0x22f   :  { %v3684_v2 = vadd.f32 %v995_v5, %v3676_v52  ;;  %v996_v3 = vmul.f32 %v2711_v1, %v95_v48 }
 0x230   :  { %v957_v26 = vmul.f32 1.442695, %v903_v31  ;;  %v904_v36 = vmul.f32 0.5, %v839_v9  ;;  %1877 = vst [vmem:[#allocation8 + $0xb8] sm:$0xff] %v839_v9  ;;  %v97_v31 = vld [vmem:[%s4158_s1 + $0xa8] sm:$0xff]  ;;  %v3706_v9 = vadd.f32 %v3631_v32, %v3370_v8 }
 0x231   :  { %4193 = vst [vmem:[#allocation18_spill] sm:$0xff] %v3684_v2  ;;  %v1059_v47 = vmul.f32 %v3684_v2, %v3684_v2  ;;  %v3689_v10 = vadd.f32 %v996_v3, %v3681_v19 }
 0x232   :  { %2716 = vpow2.f32 %v957_v26  ;;  %v959_v34 = vmul.f32 1.442695, %v904_v36  ;;  %v3691_v35 = vpop.f32.mrb[48].mxu1 }
 0x233   :  { %4194 = vst [vmem:[#allocation19_spill] sm:$0xff] %v3689_v10  ;;  %v844_v53 = vpop.f32.mrb[49].mxu1  ;;  %1109 = vadd.xlane.f32.xlu0 %v1059_v47  ;;  %v1060_v48 = vmul.f32 %v3689_v10, %v3689_v10 }
 0x234   :  { %v2713_v55 = vpop.eup %2712  ;;  %2718 = vpow2.f32 %v959_v34  ;;  %v845_v5 = vadd.f32 %v844_v53, %v3335_v41  ;;  %v3699_v1 = vpop.f32.mrb[50].mxu1  ;;  %v3711_v53 = vadd.f32 %v3639_v61, %v3370_v8  ;;  %v98_v61 = vld [vmem:[%s4158_s1 + $0xb0] sm:$0xff] }
 0x235   :  { %v848_v3 = vpop.f32.mrb[51].mxu1  ;;  %1111 = vadd.xlane.f32.xlu1 %v1060_v48  ;;  %v997_v26 = vmul.f32 %v2713_v55, %v96_v56 }
 0x236   :  { %v2715_v36 = vpop.eup %2714  ;;  %v905_v47 = vmul.f32 0.5, %v845_v5  ;;  %1878 = vst [vmem:[#allocation8 + $0xc0] sm:$0xff] %v845_v5  ;;  %v849_v34 = vadd.f32 %v848_v3, %v3335_v41 }
 0x237   :  { %v3714_v39 = vadd.f32 %v997_v26, %v3706_v9  ;;  %v998_v63 = vmul.f32 %v2715_v36, %v97_v31 }
 0x238   :  { %v961_v58 = vmul.f32 1.442695, %v905_v47  ;;  %v906_v38 = vmul.f32 0.5, %v849_v34  ;;  %1879 = vst [vmem:[#allocation8 + $0xc8] sm:$0xff] %v849_v34 }
 0x239   :  { %4195 = vst [vmem:[#allocation20_spill] sm:$0xff] %v3714_v39  ;;  %v1061_v32 = vmul.f32 %v3714_v39, %v3714_v39  ;;  %v3719_v56 = vadd.f32 %v998_v63, %v3711_v53 }
 0x23a   :  { %2720 = vpow2.f32 %v961_v58  ;;  %v963_v48 = vmul.f32 1.442695, %v906_v38  ;;  %v3721_v55 = vpop.f32.mrb[52].mxu1  ;;  %v99_v58 = vld [vmem:[%s4158_s1 + $0xb8] sm:$0xff]  ;;  %v3736_v38 = vadd.f32 %v3661_v25, %v3370_v8 }
 0x23b   :  { %4196 = vst [vmem:[#allocation21_spill] sm:$0xff] %v3719_v56  ;;  %v854_v5 = vpop.f32.mrb[53].mxu1  ;;  %1113 = vadd.xlane.f32.xlu0 %v1061_v32  ;;  %v1062_v31 = vmul.f32 %v3719_v56, %v3719_v56 }
 0x23c   :  { %v2717_v3 = vpop.eup %2716  ;;  %2722 = vpow2.f32 %v963_v48  ;;  %v855_v26 = vadd.f32 %v854_v5, %v3335_v41  ;;  %v3729_v36 = vpop.f32.mrb[54].mxu1  ;;  %v3741_v5 = vadd.f32 %v3669_v46, %v3370_v8  ;;  %v100_v46 = vld [vmem:[%s4158_s1 + $0xc0] sm:$0xff] }
 0x23d   :  { %v858_v63 = vpop.f32.mrb[55].mxu1  ;;  %1115 = vadd.xlane.f32.xlu1 %v1062_v31  ;;  %v999_v47 = vmul.f32 %v2717_v3, %v98_v61 }
 0x23e   :  { %v2719_v34 = vpop.eup %2718  ;;  %v907_v32 = vmul.f32 0.5, %v855_v26  ;;  %1880 = vst [vmem:[#allocation8 + $0xd0] sm:$0xff] %v855_v26  ;;  %v859_v48 = vadd.f32 %v858_v63, %v3335_v41 }
 0x23f   :  { %v3744_v39 = vadd.f32 %v999_v47, %v3736_v38  ;;  %v1000_v56 = vmul.f32 %v2719_v34, %v99_v58 }
 0x240   :  { %v965_v2 = vmul.f32 1.442695, %v907_v32  ;;  %v908_v10 = vmul.f32 0.5, %v859_v48  ;;  %1881 = vst [vmem:[#allocation8 + $0xd8] sm:$0xff] %v859_v48 }
 0x241   :  { %4197 = vst [vmem:[#allocation22_spill] sm:$0xff] %v3744_v39  ;;  %v1063_v25 = vmul.f32 %v3744_v39, %v3744_v39  ;;  %v3749_v61 = vadd.f32 %v1000_v56, %v3741_v5 }
 0x242   :  { %2724 = vpow2.f32 %v965_v2  ;;  %v967_v31 = vmul.f32 1.442695, %v908_v10  ;;  %v862_v3 = vpop.f32.mrb[56].mxu1  ;;  %v101_v2 = vld [vmem:[%s4158_s1 + $0xc8] sm:$0xff]  ;;  %v3762_v10 = vadd.f32 %v3691_v35, %v3370_v8 }
 0x243   :  { %4198 = vst [vmem:[#allocation23_spill] sm:$0xff] %v3749_v61  ;;  %v864_v26 = vpop.f32.mrb[57].mxu1  ;;  %1117 = vadd.xlane.f32.xlu0 %v1063_v25  ;;  %v1064_v58 = vmul.f32 %v3749_v61, %v3749_v61 }
 0x244   :  { %v2721_v63 = vpop.eup %2720  ;;  %2726 = vpow2.f32 %v967_v31  ;;  %v865_v47 = vadd.f32 %v864_v26, %v3335_v41  ;;  %v866_v34 = vpop.f32.mrb[58].mxu1  ;;  %v3767_v31 = vadd.f32 %v3699_v1, %v3370_v8  ;;  %v102_v1 = vld [vmem:[%s4158_s1 + $0xd0] sm:$0xff] }
 0x245   :  { %v868_v56 = vpop.f32.mrb[59].mxu1  ;;  %1119 = vadd.xlane.f32.xlu1 %v1064_v58  ;;  %v1001_v32 = vmul.f32 %v2721_v63, %v100_v46 }
 0x246   :  { %v2723_v48 = vpop.eup %2722  ;;  %v909_v25 = vmul.f32 0.5, %v865_v47  ;;  %1882 = vst [vmem:[#allocation8 + $0xe0] sm:$0xff] %v865_v47  ;;  %v869_v39 = vadd.f32 %v868_v56, %v3335_v41 }
 0x247   :  { %v3770_v26 = vadd.f32 %v1001_v32, %v3762_v10  ;;  %v1002_v61 = vmul.f32 %v2723_v48, %v101_v2 }
 0x248   :  { %v969_v7 = vmul.f32 1.442695, %v909_v25  ;;  %v910_v22 = vmul.f32 0.5, %v869_v39  ;;  %1883 = vst [vmem:[#allocation8 + $0xe8] sm:$0xff] %v869_v39 }
 0x249   :  { %4199 = vst [vmem:[#allocation24_spill] sm:$0xff] %v3770_v26  ;;  %v1065_v35 = vmul.f32 %v3770_v26, %v3770_v26  ;;  %v3775_v46 = vadd.f32 %v1002_v61, %v3767_v31 }
 0x24a   :  { %2728 = vpow2.f32 %v969_v7  ;;  %v971_v58 = vmul.f32 1.442695, %v910_v22  ;;  %v872_v63 = vpop.f32.mrb[60].mxu1  ;;  %v103_v7 = vld [vmem:[%s4158_s1 + $0xd8] sm:$0xff]  ;;  %v3788_v22 = vadd.f32 %v3721_v55, %v3370_v8 }
 0x24b   :  { %4200 = vst [vmem:[#allocation25_spill] sm:$0xff] %v3775_v46  ;;  %v874_v47 = vpop.f32.mrb[61].mxu1  ;;  %1121 = vadd.xlane.f32.xlu0 %v1065_v35  ;;  %v1066_v2 = vmul.f32 %v3775_v46, %v3775_v46 }
 0x24c   :  { %v2725_v56 = vpop.eup %2724  ;;  %2730 = vpow2.f32 %v971_v58  ;;  %v875_v39 = vadd.f32 %v874_v47, %v3335_v41  ;;  %v876_v32 = vpop.f32.mrb[62].mxu1  ;;  %v3793_v58 = vadd.f32 %v3729_v36, %v3370_v8 }
 0x24d   :  { %v878_v61 = vpop.f32.mrb[63].mxu1  ;;  %1123 = vadd.xlane.f32.xlu1 %v1066_v2  ;;  %v1003_v48 = vmul.f32 %v2725_v56, %v102_v1 }
 0x24e   :  { %v2727_v25 = vpop.eup %2726  ;;  %v911_v35 = vmul.f32 0.5, %v875_v39  ;;  %1884 = vst [vmem:[#allocation8 + $0xf0] sm:$0xff] %v875_v39  ;;  %v879_v26 = vadd.f32 %v878_v61, %v3335_v41  ;;  %v104_v41 = vld [vmem:[%s4158_s1 + $0xe0] sm:$0xff]  ;;  %v3812_v39 = vadd.f32 %v862_v3, %v3370_v8  ;;  %v106_v3 = vld [vmem:[%s4158_s1 + $0xf0] sm:$0xff] }
 0x24f   :  { %v3796_v47 = vadd.f32 %v1003_v48, %v3788_v22  ;;  %v1004_v46 = vmul.f32 %v2727_v25, %v103_v7 }
 0x250   :  { %v973_v18 = vmul.f32 1.442695, %v911_v35  ;;  %v912_v15 = vmul.f32 0.5, %v879_v26  ;;  %1885 = vst [vmem:[#allocation8 + $0xf8] sm:$0xff] %v879_v26  ;;  %v105_v26 = vld [vmem:[%s4158_s1 + $0xe8] sm:$0xff] }
 0x251   :  { %v1067_v55 = vmul.f32 %v3796_v47, %v3796_v47  ;;  %v3801_v1 = vadd.f32 %v1004_v46, %v3793_v58  ;;  %v3815_v46 = vadd.f32 %v866_v34, %v3370_v8 }
 0x252   :  { %2732 = vpow2.f32 %v973_v18  ;;  %v975_v2 = vmul.f32 1.442695, %v912_v15 }
 0x253   :  { %1125 = vadd.xlane.f32.xlu0 %v1067_v55  ;;  %v1068_v36 = vmul.f32 %v3801_v1, %v3801_v1  ;;  %v107_v55 = vld [vmem:[%s4158_s1 + $0xf8] sm:$0xff] }
 0x254   :  { %v2729_v56 = vpop.eup %2728  ;;  %2734 = vpow2.f32 %v975_v2  ;;  %v3834_v2 = vadd.f32 %v872_v63, %v3370_v8 }
 0x255   :  { %1127 = vadd.xlane.f32.xlu1 %v1068_v36  ;;  %v1005_v18 = vmul.f32 %v2729_v56, %v104_v41  ;;  %v3837_v56 = vadd.f32 %v876_v32, %v3370_v8  ;;  %v1234_v8 = vmul.f32 %v3388_v23, %v3388_v23  ;;  %v1235_v32 = vmul.f32 %v3416_v42, %v3416_v42 }
 0x256   :  { %v2731_v15 = vpop.eup %2730 }
 0x257   :  { %v3818_v7 = vadd.f32 %v1005_v18, %v3812_v39  ;;  %v1006_v61 = vmul.f32 %v2731_v15, %v105_v26 }
 0x259   :  { %v1069_v48 = vmul.f32 %v3818_v7, %v3818_v7  ;;  %v3823_v25 = vadd.f32 %v1006_v61, %v3815_v46 }
 0x25b   :  { %1129 = vadd.xlane.f32.xlu0 %v1069_v48  ;;  %v1070_v35 = vmul.f32 %v3823_v25, %v3823_v25  ;;  %v1233_v48 = vmul.f32 %v3384_v17, %v3384_v17 }
 0x25c   :  { %v2733_v34 = vpop.eup %2732 }
 0x25d   :  { %1131 = vadd.xlane.f32.xlu1 %v1070_v35  ;;  %v1007_v41 = vmul.f32 %v2733_v34, %v106_v3  ;;  %v1236_v3 = vmul.f32 %v3423_v49, %v3423_v49  ;;  %v1237_v35 = vmul.f32 %v3452_v4, %v3452_v4  ;;  %v1238_v34 = vmul.f32 %v3459_v14, %v3459_v14 }
 0x25e   :  { %v2735_v36 = vpop.eup %2734 }
 0x25f   :  { %v3840_v26 = vadd.f32 %v1007_v41, %v3834_v2  ;;  %v1008_v18 = vmul.f32 %v2735_v36, %v107_v55  ;;  %v1239_v55 = vmul.f32 %v3484_v33, %v3484_v33  ;;  %v1240_v41 = vmul.f32 %v3489_v44, %v3489_v44 }
 0x260   :  { %v1241_v36 = vmul.f32 %v3514_v0, %v3514_v0 }
 0x261   :  { %v1071_v15 = vmul.f32 %v3840_v26, %v3840_v26  ;;  %v3845_v61 = vadd.f32 %v1008_v18, %v3837_v56  ;;  %v1242_v18 = vmul.f32 %v3519_v11, %v3519_v11 }
 0x263   :  { %1133 = vadd.xlane.f32.xlu0 %v1071_v15  ;;  %v1072_v63 = vmul.f32 %v3845_v61, %v3845_v61 }
 0x265   :  { %1135 = vadd.xlane.f32.xlu1 %v1072_v63 }
 0x267   :  { %1265 = vadd.xlane.f32.xlu0 %v1233_v48  ;;  %v1243_v48 = vmul.f32 %v3556_v43, %v3556_v43 }
 0x269   :  { %1267 = vadd.xlane.f32.xlu1 %v1234_v8  ;;  %v1244_v8 = vmul.f32 %v3561_v37, %v3561_v37 }
 0x26b   :  { %1269 = vadd.xlane.f32.xlu0 %v1235_v32 }
 0x26d   :  { %1271 = vadd.xlane.f32.xlu1 %v1236_v3 }
 0x26f   :  { %1273 = vadd.xlane.f32.xlu0 %v1237_v35  ;;  %v1245_v35 = vmul.f32 %v3586_v60, %v3586_v60 }
 0x271   :  { %1275 = vadd.xlane.f32.xlu1 %v1238_v34  ;;  %v1246_v34 = vmul.f32 %v3591_v27, %v3591_v27 }
 0x273   :  { %1277 = vadd.xlane.f32.xlu0 %v1239_v55 }
 0x275   :  { %1279 = vadd.xlane.f32.xlu1 %v1240_v41 }
 0x277   :  { %1281 = vadd.xlane.f32.xlu0 %v1241_v36  ;;  %v1247_v36 = vmul.f32 %v3616_v59, %v3616_v59 }
 0x278   :  { %v1074_v15 = vpop.xlane.xlu0 %1073 }
 0x279   :  { %v1137_v63 = vmax.f32 %v1074_v15, 1e-24  ;;  %1283 = vadd.xlane.f32.xlu1 %v1242_v18  ;;  %v1248_v18 = vmul.f32 %v3621_v13, %v3621_v13 }
 0x27b   :  { %1285 = vadd.xlane.f32.xlu0 %v1243_v48  ;;  %2736 = vrsqrt.f32 %v1137_v63  ;;  %v1249_v48 = vmul.f32 %v3646_v30, %v3646_v30 }
 0x27c   :  { %v1076_v32 = vpop.xlane.xlu0 %1075 }
 0x27d   :  { %v1138_v3 = vmax.f32 %v1076_v32, 1e-24  ;;  %1287 = vadd.xlane.f32.xlu1 %v1244_v8  ;;  %v1250_v32 = vmul.f32 %v3651_v6, %v3651_v6 }
 0x27f   :  { %2738 = vrsqrt.f32 %v1138_v3  ;;  %1289 = vadd.xlane.f32.xlu0 %v1245_v35 }
 0x280   :  { %v1078_v55 = vpop.xlane.xlu1 %1077 }
 0x281   :  { %v1139_v41 = vmax.f32 %v1078_v55, 1e-24  ;;  %1291 = vadd.xlane.f32.xlu1 %v1246_v34  ;;  %v1251_v55 = vmul.f32 %v3676_v52, %v3676_v52 }
 0x283   :  { %1293 = vadd.xlane.f32.xlu0 %v1247_v36  ;;  %2740 = vrsqrt.f32 %v1139_v41 }
 0x284   :  { %v1080_v15 = vpop.xlane.xlu1 %1079 }
 0x285   :  { %v1140_v63 = vmax.f32 %v1080_v15, 1e-24  ;;  %1295 = vadd.xlane.f32.xlu1 %v1248_v18  ;;  %v2737_v8 = vpop.eup %2736 }
 0x286   :  { %v1201_v41 = vmul.f32 %v2737_v8, %v3391_v24  ;;  %v1254_v24 = vmul.f32 %v3711_v53, %v3711_v53 }
 0x287   :  { %2742 = vrsqrt.f32 %v1140_v63  ;;  %1297 = vadd.xlane.f32.xlu0 %v1249_v48  ;;  %v1252_v63 = vmul.f32 %v3681_v19, %v3681_v19 }
 0x288   :  { %v1082_v3 = vpop.xlane.xlu0 %1081 }
 0x289   :  { %v2739_v35 = vpop.eup %2738  ;;  %v1141_v34 = vmax.f32 %v1082_v3, 1e-24  ;;  %1299 = vadd.xlane.f32.xlu1 %v1250_v32  ;;  %v1253_v32 = vmul.f32 %v3706_v9, %v3706_v9 }
 0x28a   :  { %v1202_v36 = vmul.f32 %v2739_v35, %v3396_v28  ;;  %v1084_v18 = vpop.xlane.xlu1 %1083  ;;  %v4201_v28 = vmov 0  }
 0x28b   :  { %v1142_v15 = vmax.f32 %v1084_v18, 1e-24  ;;  %1301 = vadd.xlane.f32.xlu0 %v1251_v55  ;;  %2744 = vrsqrt.f32 %v1141_v34  ;;  %v1255_v55 = vmul.f32 %v3736_v38, %v3736_v38 }
 0x28c   :  { %v1425_v48 = vpack.c.bf16 %v1202_v36, %v1201_v41 }
 0x28d   :  { %2746 = vrsqrt.f32 %v1142_v15  ;;  %1303 = vadd.xlane.f32.xlu1 %v1252_v63  ;;  %v2741_v3 = vpop.eup %2740  ;;  %v1256_v63 = vmul.f32 %v3741_v5, %v3741_v5 }
 0x28e   :  { %1598 = vmatmul.mubr.bf16.vlgmr.msra.gmra.mrb[64].mxu0 %v1425_v48  ;;  %2031 = vmatmul.mubr.bf16.vlgmr.msra.gmra.mrb[64].mxu1 %v1425_v48  ;;  %v1203_v36 = vmul.f32 %v2741_v3, %v3426_v50  ;;  %v1258_v50 = vmul.f32 %v3767_v31, %v3767_v31 }
 0x28f   :  { %1305 = vadd.xlane.f32.xlu0 %v1253_v32  ;;  %1607 = vmatprep.mubr.bf16.mxu0 %v4201_v28  ;;  %v1257_v32 = vmul.f32 %v3762_v10, %v3762_v10 }
 0x290   :  { %v1086_v8 = vpop.xlane.xlu0 %1085  ;;  %2040 = vmatprep.mubr.bf16.mxu1 %v4201_v28 }
 0x291   :  { %v2743_v35 = vpop.eup %2742  ;;  %v1143_v34 = vmax.f32 %v1086_v8, 1e-24  ;;  %1307 = vadd.xlane.f32.xlu1 %v1254_v24 }
 0x292   :  { %v1088_v41 = vpop.xlane.xlu1 %1087  ;;  %v1204_v18 = vmul.f32 %v2743_v35, %v3437_v57 }
 0x293   :  { %v1144_v15 = vmax.f32 %v1088_v41, 1e-24  ;;  %1309 = vadd.xlane.f32.xlu0 %v1255_v55  ;;  %2748 = vrsqrt.f32 %v1143_v34  ;;  %v1259_v34 = vmul.f32 %v3788_v22, %v3788_v22 }
 0x294   :  { %v1426_v48 = vpack.c.bf16 %v1204_v18, %v1203_v36  ;;  %v1260_v18 = vmul.f32 %v3793_v58, %v3793_v58 }
 0x295   :  { %2750 = vrsqrt.f32 %v1144_v15  ;;  %1311 = vadd.xlane.f32.xlu1 %v1256_v63  ;;  %v2745_v24 = vpop.eup %2744 }
 0x296   :  { %1608 = vmatmul.mubr.bf16.gmra.mrb[68].mxu0 %v1426_v48  ;;  %2041 = vmatmul.mubr.bf16.gmra.mrb[68].mxu1 %v1426_v48  ;;  %v1205_v41 = vmul.f32 %v2745_v24, %v3462_v16  ;;  %v1262_v16 = vmul.f32 %v3815_v46, %v3815_v46 }
 0x297   :  { %v2747_v8 = vpop.eup %2746  ;;  %1313 = vadd.xlane.f32.xlu0 %v1257_v32  ;;  %1617 = vmatprep.mubr.bf16.mxu0 %v4201_v28 }
 0x298   :  { %v1090_v57 = vpop.xlane.xlu0 %1089  ;;  %2050 = vmatprep.mubr.bf16.mxu1 %v4201_v28  ;;  %v1206_v3 = vmul.f32 %v2747_v8, %v3467_v21  ;;  %v1261_v21 = vmul.f32 %v3812_v39, %v3812_v39 }
 0x299   :  { %v1145_v35 = vmax.f32 %v1090_v57, 1e-24  ;;  %1315 = vadd.xlane.f32.xlu1 %v1258_v50  ;;  %v1263_v50 = vmul.f32 %v3834_v2, %v3834_v2 }
 0x29a   :  { %v1092_v55 = vpop.xlane.xlu1 %1091  ;;  %v1427_v15 = vpack.c.bf16 %v1206_v3, %v1205_v41 }
 0x29b   :  { %v1146_v36 = vmax.f32 %v1092_v55, 1e-24  ;;  %1317 = vadd.xlane.f32.xlu0 %v1259_v34  ;;  %2752 = vrsqrt.f32 %v1145_v35  ;;  %v1264_v34 = vmul.f32 %v3837_v56, %v3837_v56 }
 0x29d   :  { %2754 = vrsqrt.f32 %v1146_v36  ;;  %1319 = vadd.xlane.f32.xlu1 %v1260_v18  ;;  %v2749_v63 = vpop.eup %2748 }
 0x29e   :  { %1618 = vmatmul.mubr.bf16.gmra.mrb[72].mxu0 %v1427_v15  ;;  %2051 = vmatmul.mubr.bf16.gmra.mrb[72].mxu1 %v1427_v15  ;;  %v1207_v3 = vmul.f32 %v2749_v63, %v3492_v45 }
 0x29f   :  { %v2751_v48 = vpop.eup %2750  ;;  %1321 = vadd.xlane.f32.xlu0 %v1261_v21  ;;  %1627 = vmatprep.mubr.bf16.mxu0 %v4201_v28 }
 0x2a0   :  { %v1094_v32 = vpop.xlane.xlu0 %1093  ;;  %2060 = vmatprep.mubr.bf16.mxu1 %v4201_v28  ;;  %v1208_v24 = vmul.f32 %v2751_v48, %v3497_v51 }
 0x2a1   :  { %v1147_v8 = vmax.f32 %v1094_v32, 1e-24  ;;  %1323 = vadd.xlane.f32.xlu1 %v1262_v16 }
 0x2a2   :  { %v1096_v57 = vpop.xlane.xlu1 %1095  ;;  %v1428_v55 = vpack.c.bf16 %v1208_v24, %v1207_v3 }
 0x2a3   :  { %v1148_v35 = vmax.f32 %v1096_v57, 1e-24  ;;  %1325 = vadd.xlane.f32.xlu0 %v1263_v50  ;;  %2756 = vrsqrt.f32 %v1147_v8 }
 0x2a5   :  { %2758 = vrsqrt.f32 %v1148_v35  ;;  %1327 = vadd.xlane.f32.xlu1 %v1264_v34  ;;  %v2753_v41 = vpop.eup %2752 }
 0x2a6   :  { %1628 = vmatmul.mubr.bf16.gmra.mrb[76].mxu0 %v1428_v55  ;;  %2061 = vmatmul.mubr.bf16.gmra.mrb[76].mxu1 %v1428_v55  ;;  %v1209_v21 = vmul.f32 %v2753_v41, %v3522_v12 }
 0x2a7   :  { %v2755_v51 = vpop.eup %2754  ;;  %1637 = vmatprep.mubr.bf16.mxu0 %v4201_v28  ;;  %2070 = vmatprep.mubr.bf16.mxu1 %v4201_v28 }
 0x2a8   :  { %v1098_v36 = vpop.xlane.xlu0 %1097  ;;  %v1210_v45 = vmul.f32 %v2755_v51, %v3530_v20 }
 0x2a9   :  { %v1149_v18 = vmax.f32 %v1098_v36, 1e-24 }
 0x2aa   :  { %v1100_v15 = vpop.xlane.xlu1 %1099  ;;  %v1429_v48 = vpack.c.bf16 %v1210_v45, %v1209_v21 }
 0x2ab   :  { %v1150_v63 = vmax.f32 %v1100_v15, 1e-24  ;;  %2760 = vrsqrt.f32 %v1149_v18 }
 0x2ad   :  { %2762 = vrsqrt.f32 %v1150_v63  ;;  %v2757_v16 = vpop.eup %2756  ;;  %v4202_v63 = vld [vmem:[#allocation15_spill] sm:$0xff] }
 0x2ae   :  { %1638 = vmatmul.mubr.bf16.gmra.mrb[80].mxu0 %v1429_v48  ;;  %2071 = vmatmul.mubr.bf16.gmra.mrb[80].mxu1 %v1429_v48  ;;  %v1211_v57 = vmul.f32 %v2757_v16, %v3564_v54 }
 0x2af   :  { %v2759_v32 = vpop.eup %2758  ;;  %1647 = vmatprep.mubr.bf16.mxu0 %v4201_v28  ;;  %2080 = vmatprep.mubr.bf16.mxu1 %v4201_v28 }
 0x2b0   :  { %v1102_v24 = vpop.xlane.xlu0 %1101  ;;  %v1212_v8 = vmul.f32 %v2759_v32, %v3569_v62  ;;  %v4203_v32 = vld [vmem:[#allocation14_spill] sm:$0xff] }
 0x2b1   :  { %v1151_v20 = vmax.f32 %v1102_v24, 1e-24 }
 0x2b2   :  { %v1104_v50 = vpop.xlane.xlu1 %1103  ;;  %v1430_v3 = vpack.c.bf16 %v1212_v8, %v1211_v57 }
 0x2b3   :  { %v1152_v12 = vmax.f32 %v1104_v50, 1e-24  ;;  %2764 = vrsqrt.f32 %v1151_v20 }
 0x2b5   :  { %2766 = vrsqrt.f32 %v1152_v12  ;;  %v2761_v35 = vpop.eup %2760  ;;  %v4204_v12 = vld [vmem:[#allocation17_spill] sm:$0xff] }
 0x2b6   :  { %1648 = vmatmul.mubr.bf16.gmra.mrb[84].mxu0 %v1430_v3  ;;  %2081 = vmatmul.mubr.bf16.gmra.mrb[84].mxu1 %v1430_v3  ;;  %v1213_v36 = vmul.f32 %v2761_v35, %v3594_v29 }
 0x2b7   :  { %v2763_v34 = vpop.eup %2762  ;;  %1657 = vmatprep.mubr.bf16.mxu0 %v4201_v28  ;;  %2090 = vmatprep.mubr.bf16.mxu1 %v4201_v28 }
 0x2b8   :  { %v1106_v55 = vpop.xlane.xlu0 %1105  ;;  %v1214_v41 = vmul.f32 %v2763_v34, %v3599_v40 }
 0x2b9   :  { %v1153_v62 = vmax.f32 %v1106_v55, 1e-24  ;;  %v4205_v55 = vld [vmem:[#allocation16_spill] sm:$0xff] }
 0x2ba   :  { %v1108_v51 = vpop.xlane.xlu1 %1107  ;;  %v1431_v45 = vpack.c.bf16 %v1214_v41, %v1213_v36 }
 0x2bb   :  { %v1154_v54 = vmax.f32 %v1108_v51, 1e-24  ;;  %2768 = vrsqrt.f32 %v1153_v62 }
 0x2bd   :  { %2770 = vrsqrt.f32 %v1154_v54  ;;  %v2765_v18 = vpop.eup %2764 }
 0x2be   :  { %1658 = vmatmul.mubr.bf16.gmra.mrb[88].mxu0 %v1431_v45  ;;  %2091 = vmatmul.mubr.bf16.gmra.mrb[88].mxu1 %v1431_v45  ;;  %v1215_v24 = vmul.f32 %v2765_v18, %v4203_v32  ;;  %v4206_v18 = vld [vmem:[#allocation19_spill] sm:$0xff] }
 0x2bf   :  { %v2767_v15 = vpop.eup %2766  ;;  %1667 = vmatprep.mubr.bf16.mxu0 %v4201_v28  ;;  %2100 = vmatprep.mubr.bf16.mxu1 %v4201_v28 }
 0x2c0   :  { %v1110_v21 = vpop.xlane.xlu0 %1109  ;;  %v1216_v48 = vmul.f32 %v2767_v15, %v4202_v63 }
 0x2c1   :  { %v1155_v40 = vmax.f32 %v1110_v21, 1e-24 }
 0x2c2   :  { %v1112_v16 = vpop.xlane.xlu1 %1111  ;;  %v1432_v8 = vpack.c.bf16 %v1216_v48, %v1215_v24  ;;  %v4207_v48 = vld [vmem:[#allocation18_spill] sm:$0xff] }
 0x2c3   :  { %v1156_v29 = vmax.f32 %v1112_v16, 1e-24  ;;  %2772 = vrsqrt.f32 %v1155_v40 }
 0x2c5   :  { %2774 = vrsqrt.f32 %v1156_v29  ;;  %v2769_v20 = vpop.eup %2768 }
 0x2c6   :  { %1668 = vmatmul.mubr.bf16.gmra.mrb[92].mxu0 %v1432_v8  ;;  %2101 = vmatmul.mubr.bf16.gmra.mrb[92].mxu1 %v1432_v8  ;;  %v1217_v41 = vmul.f32 %v2769_v20, %v4205_v55  ;;  %v4208_v20 = vld [vmem:[#allocation21_spill] sm:$0xff] }
 0x2c7   :  { %v2771_v50 = vpop.eup %2770  ;;  %1677 = vmatprep.mubr.bf16.mxu0 %v4201_v28  ;;  %2110 = vmatprep.mubr.bf16.mxu1 %v4201_v28 }
 0x2c8   :  { %v1114_v57 = vpop.xlane.xlu0 %1113  ;;  %v1218_v3 = vmul.f32 %v2771_v50, %v4204_v12 }
 0x2c9   :  { %v1157_v35 = vmax.f32 %v1114_v57, 1e-24 }
 0x2ca   :  { %v1116_v34 = vpop.xlane.xlu1 %1115  ;;  %v1433_v51 = vpack.c.bf16 %v1218_v3, %v1217_v41  ;;  %v4209_v3 = vld [vmem:[#allocation20_spill] sm:$0xff] }
 0x2cb   :  { %v1158_v62 = vmax.f32 %v1116_v34, 1e-24  ;;  %2776 = vrsqrt.f32 %v1157_v35 }
 0x2cd   :  { %2778 = vrsqrt.f32 %v1158_v62  ;;  %v2773_v36 = vpop.eup %2772 }
 0x2ce   :  { %1678 = vmatmul.mubr.bf16.gmra.mrb[96].mxu0 %v1433_v51  ;;  %2111 = vmatmul.mubr.bf16.gmra.mrb[96].mxu1 %v1433_v51  ;;  %v1219_v40 = vmul.f32 %v2773_v36, %v4207_v48  ;;  %v4210_v36 = vld [vmem:[#allocation23_spill] sm:$0xff] }
 0x2cf   :  { %v2775_v54 = vpop.eup %2774  ;;  %1687 = vmatprep.mubr.bf16.mxu0 %v4201_v28  ;;  %2120 = vmatprep.mubr.bf16.mxu1 %v4201_v28 }
 0x2d0   :  { %v1118_v45 = vpop.xlane.xlu0 %1117  ;;  %v1220_v15 = vmul.f32 %v2775_v54, %v4206_v18 }
 0x2d1   :  { %v1159_v21 = vmax.f32 %v1118_v45, 1e-24 }
 0x2d2   :  { %v1120_v63 = vpop.xlane.xlu1 %1119  ;;  %v1434_v32 = vpack.c.bf16 %v1220_v15, %v1219_v40  ;;  %v4211_v15 = vld [vmem:[#allocation22_spill] sm:$0xff] }
 0x2d3   :  { %v1160_v16 = vmax.f32 %v1120_v63, 1e-24  ;;  %2780 = vrsqrt.f32 %v1159_v21 }
 0x2d5   :  { %2782 = vrsqrt.f32 %v1160_v16  ;;  %v2777_v24 = vpop.eup %2776 }
 0x2d6   :  { %1688 = vmatmul.mubr.bf16.gmra.mrb[100].mxu0 %v1434_v32  ;;  %2121 = vmatmul.mubr.bf16.gmra.mrb[100].mxu1 %v1434_v32  ;;  %v1221_v35 = vmul.f32 %v2777_v24, %v4209_v3  ;;  %v4212_v24 = vld [vmem:[#allocation25_spill] sm:$0xff] }
 0x2d7   :  { %v2779_v29 = vpop.eup %2778  ;;  %1697 = vmatprep.mubr.bf16.mxu0 %v4201_v28  ;;  %2130 = vmatprep.mubr.bf16.mxu1 %v4201_v28 }
 0x2d8   :  { %v1122_v8 = vpop.xlane.xlu0 %1121  ;;  %v1222_v50 = vmul.f32 %v2779_v29, %v4208_v20 }
 0x2d9   :  { %v1161_v57 = vmax.f32 %v1122_v8, 1e-24 }
 0x2da   :  { %v1124_v12 = vpop.xlane.xlu1 %1123  ;;  %v1435_v55 = vpack.c.bf16 %v1222_v50, %v1221_v35  ;;  %v4213_v50 = vld [vmem:[#allocation24_spill] sm:$0xff] }
 0x2db   :  { %v1162_v34 = vmax.f32 %v1124_v12, 1e-24  ;;  %2784 = vrsqrt.f32 %v1161_v57 }
 0x2dd   :  { %2786 = vrsqrt.f32 %v1162_v34  ;;  %v2781_v41 = vpop.eup %2780 }
 0x2de   :  { %1698 = vmatmul.mubr.bf16.gmra.mrb[104].mxu0 %v1435_v55  ;;  %2131 = vmatmul.mubr.bf16.gmra.mrb[104].mxu1 %v1435_v55  ;;  %v1223_v21 = vmul.f32 %v2781_v41, %v4211_v15 }
 0x2df   :  { %v2783_v62 = vpop.eup %2782  ;;  %1707 = vmatprep.mubr.bf16.mxu0 %v4201_v28  ;;  %2140 = vmatprep.mubr.bf16.mxu1 %v4201_v28 }
 0x2e0   :  { %v1126_v51 = vpop.xlane.xlu0 %1125  ;;  %v1224_v54 = vmul.f32 %v2783_v62, %v4210_v36 }
 0x2e1   :  { %v1163_v45 = vmax.f32 %v1126_v51, 1e-24 }
 0x2e2   :  { %v1128_v18 = vpop.xlane.xlu1 %1127  ;;  %v1436_v48 = vpack.c.bf16 %v1224_v54, %v1223_v21 }
 0x2e3   :  { %v1164_v63 = vmax.f32 %v1128_v18, 1e-24  ;;  %2788 = vrsqrt.f32 %v1163_v45 }
 0x2e5   :  { %2790 = vrsqrt.f32 %v1164_v63  ;;  %v2785_v40 = vpop.eup %2784 }
 0x2e6   :  { %1708 = vmatmul.mubr.bf16.gmra.mrb[108].mxu0 %v1436_v48  ;;  %2141 = vmatmul.mubr.bf16.gmra.mrb[108].mxu1 %v1436_v48  ;;  %v1225_v57 = vmul.f32 %v2785_v40, %v4213_v50 }
 0x2e7   :  { %v2787_v16 = vpop.eup %2786  ;;  %1717 = vmatprep.mubr.bf16.mxu0 %v4201_v28  ;;  %2150 = vmatprep.mubr.bf16.mxu1 %v4201_v28 }
 0x2e8   :  { %v1130_v32 = vpop.xlane.xlu0 %1129  ;;  %v1226_v29 = vmul.f32 %v2787_v16, %v4212_v24 }
 0x2e9   :  { %v1165_v8 = vmax.f32 %v1130_v32, 1e-24 }
 0x2ea   :  { %v1132_v20 = vpop.xlane.xlu1 %1131  ;;  %v1437_v3 = vpack.c.bf16 %v1226_v29, %v1225_v57 }
 0x2eb   :  { %v1166_v12 = vmax.f32 %v1132_v20, 1e-24  ;;  %2792 = vrsqrt.f32 %v1165_v8 }
 0x2ed   :  { %2794 = vrsqrt.f32 %v1166_v12  ;;  %v2789_v35 = vpop.eup %2788 }
 0x2ee   :  { %1718 = vmatmul.mubr.bf16.gmra.mrb[112].mxu0 %v1437_v3  ;;  %2151 = vmatmul.mubr.bf16.gmra.mrb[112].mxu1 %v1437_v3  ;;  %v1227_v36 = vmul.f32 %v2789_v35, %v3796_v47 }
 0x2ef   :  { %v2791_v34 = vpop.eup %2790  ;;  %1727 = vmatprep.mubr.bf16.mxu0 %v4201_v28  ;;  %2160 = vmatprep.mubr.bf16.mxu1 %v4201_v28 }
 0x2f0   :  { %v1134_v55 = vpop.xlane.xlu0 %1133  ;;  %v1228_v41 = vmul.f32 %v2791_v34, %v3801_v1 }
 0x2f1   :  { %v1167_v62 = vmax.f32 %v1134_v55, 1e-24 }
 0x2f2   :  { %v1136_v51 = vpop.xlane.xlu1 %1135  ;;  %v1438_v18 = vpack.c.bf16 %v1228_v41, %v1227_v36 }
 0x2f3   :  { %v1168_v54 = vmax.f32 %v1136_v51, 1e-24  ;;  %2796 = vrsqrt.f32 %v1167_v62 }
 0x2f4   :  { %v1266_v45 = vpop.xlane.xlu0 %1265 }
 0x2f5   :  { %2798 = vrsqrt.f32 %v1168_v54  ;;  %v1329_v15 = vmax.f32 %v1266_v45, 1e-24  ;;  %v2793_v21 = vpop.eup %2792 }
 0x2f6   :  { %v1268_v63 = vpop.xlane.xlu1 %1267  ;;  %1728 = vmatmul.mubr.bf16.gmra.mrb[116].mxu0 %v1438_v18  ;;  %2161 = vmatmul.mubr.bf16.gmra.mrb[116].mxu1 %v1438_v18  ;;  %v1229_v24 = vmul.f32 %v2793_v21, %v3818_v7 }
 0x2f7   :  { %v2795_v48 = vpop.eup %2794  ;;  %2800 = vrsqrt.f32 %v1329_v15  ;;  %v1330_v40 = vmax.f32 %v1268_v63, 1e-24  ;;  %1737 = vmatprep.mubr.bf16.mxu0 %v4201_v28  ;;  %2170 = vmatprep.mubr.bf16.mxu1 %v4201_v28 }
 0x2f8   :  { %v1270_v1 = vpop.xlane.xlu0 %1269  ;;  %v1230_v47 = vmul.f32 %v2795_v48, %v3823_v25 }
 0x2f9   :  { %2802 = vrsqrt.f32 %v1330_v40  ;;  %v1331_v16 = vmax.f32 %v1270_v1, 1e-24 }
 0x2fa   :  { %v1272_v32 = vpop.xlane.xlu1 %1271  ;;  %v1439_v20 = vpack.c.bf16 %v1230_v47, %v1229_v24 }
 0x2fb   :  { %2804 = vrsqrt.f32 %v1331_v16  ;;  %v1332_v29 = vmax.f32 %v1272_v32, 1e-24 }
 0x2fc   :  { %v1274_v8 = vpop.xlane.xlu0 %1273 }
 0x2fd   :  { %2806 = vrsqrt.f32 %v1332_v29  ;;  %v1333_v50 = vmax.f32 %v1274_v8, 1e-24  ;;  %v2797_v57 = vpop.eup %2796 }
 0x2fe   :  { %v1276_v12 = vpop.xlane.xlu1 %1275  ;;  %1738 = vmatmul.mubr.bf16.gmra.mrb[120].mxu0 %v1439_v20  ;;  %2171 = vmatmul.mubr.bf16.gmra.mrb[120].mxu1 %v1439_v20  ;;  %v1231_v51 = vmul.f32 %v2797_v57, %v3840_v26 }
 0x2ff   :  { %v2799_v3 = vpop.eup %2798  ;;  %2808 = vrsqrt.f32 %v1333_v50  ;;  %v1334_v35 = vmax.f32 %v1276_v12, 1e-24  ;;  %1747 = vmatprep.mubr.bf16.mxu0 %v4201_v28  ;;  %2180 = vmatprep.mubr.bf16.mxu1 %v4201_v28 }
 0x300   :  { %v1278_v25 = vpop.xlane.xlu0 %1277  ;;  %v1232_v7 = vmul.f32 %v2799_v3, %v3845_v61 }
 0x301   :  { %v2801_v34 = vpop.eup %2800  ;;  %2810 = vrsqrt.f32 %v1334_v35  ;;  %v1335_v55 = vmax.f32 %v1278_v25, 1e-24 }
 0x302   :  { %v1393_v41 = vmul.f32 %v2801_v34, %v3384_v17  ;;  %v1280_v62 = vpop.xlane.xlu1 %1279  ;;  %v1440_v15 = vpack.c.bf16 %v1232_v7, %v1231_v51 }
 0x303   :  { %v2803_v36 = vpop.eup %2802  ;;  %2812 = vrsqrt.f32 %v1335_v55  ;;  %v1336_v54 = vmax.f32 %v1280_v62, 1e-24 }
 0x304   :  { %1822 = vst [vmem:[#allocation7] sm:$0xff] %v1393_v41  ;;  %v1394_v45 = vmul.f32 %v2803_v36, %v3388_v23  ;;  %v1282_v18 = vpop.xlane.xlu0 %1281 }
 0x305   :  { %v2805_v28 = vpop.eup %2804  ;;  %2814 = vrsqrt.f32 %v1336_v54  ;;  %v1337_v21 = vmax.f32 %v1282_v18, 1e-24 }
 0x306   :  { %1823 = vst [vmem:[#allocation7 + $0x8] sm:$0xff] %v1394_v45  ;;  %v1395_v61 = vmul.f32 %v2805_v28, %v3416_v42  ;;  %v1284_v63 = vpop.xlane.xlu1 %1283  ;;  %1748 = vmatmul.mubr.bf16.gmra.mrb[124].mxu0 %v1440_v15  ;;  %2181 = vmatmul.mubr.bf16.gmra.mrb[124].mxu1 %v1440_v15 }
 0x307   :  { %v2807_v17 = vpop.eup %2806  ;;  %2816 = vrsqrt.f32 %v1337_v21  ;;  %v1338_v26 = vmax.f32 %v1284_v63, 1e-24 }
 0x308   :  { %1824 = vst [vmem:[#allocation7 + $0x10] sm:$0xff] %v1395_v61  ;;  %v1396_v48 = vmul.f32 %v2807_v17, %v3423_v49  ;;  %v1286_v40 = vpop.xlane.xlu0 %1285 }
 0x309   :  { %v2809_v1 = vpop.eup %2808  ;;  %2818 = vrsqrt.f32 %v1338_v26  ;;  %v1339_v23 = vmax.f32 %v1286_v40, 1e-24 }
 0x30a   :  { %1825 = vst [vmem:[#allocation7 + $0x18] sm:$0xff] %v1396_v48  ;;  %v1397_v47 = vmul.f32 %v2809_v1, %v3452_v4  ;;  %v1288_v16 = vpop.xlane.xlu1 %1287 }
 0x30b   :  { %v2811_v32 = vpop.eup %2810  ;;  %2820 = vrsqrt.f32 %v1339_v23  ;;  %v1340_v42 = vmax.f32 %v1288_v16, 1e-24 }
 0x30c   :  { %1826 = vst [vmem:[#allocation7 + $0x20] sm:$0xff] %v1397_v47  ;;  %v1398_v24 = vmul.f32 %v2811_v32, %v3459_v14  ;;  %v1290_v29 = vpop.xlane.xlu0 %1289 }
 0x30d   :  { %v2813_v8 = vpop.eup %2812  ;;  %2822 = vrsqrt.f32 %v1340_v42  ;;  %v1341_v20 = vmax.f32 %v1290_v29, 1e-24 }
 0x30e   :  { %1827 = vst [vmem:[#allocation7 + $0x28] sm:$0xff] %v1398_v24  ;;  %v1399_v49 = vmul.f32 %v2813_v8, %v3484_v33  ;;  %v1292_v50 = vpop.xlane.xlu1 %1291 }
 0x30f   :  { %v2815_v57 = vpop.eup %2814  ;;  %2824 = vrsqrt.f32 %v1341_v20  ;;  %v1342_v12 = vmax.f32 %v1292_v50, 1e-24 }
 0x310   :  { %1828 = vst [vmem:[#allocation7 + $0x30] sm:$0xff] %v1399_v49  ;;  %v1400_v4 = vmul.f32 %v2815_v57, %v3489_v44  ;;  %v1294_v3 = vpop.xlane.xlu0 %1293 }
 0x311   :  { %v2817_v35 = vpop.eup %2816  ;;  %2826 = vrsqrt.f32 %v1342_v12  ;;  %v1343_v25 = vmax.f32 %v1294_v3, 1e-24 }
 0x312   :  { %1829 = vst [vmem:[#allocation7 + $0x38] sm:$0xff] %v1400_v4  ;;  %v1401_v14 = vmul.f32 %v2817_v35, %v3514_v0  ;;  %v1296_v7 = vpop.xlane.xlu1 %1295 }
 0x313   :  { %v2819_v34 = vpop.eup %2818  ;;  %2828 = vrsqrt.f32 %v1343_v25  ;;  %v1344_v55 = vmax.f32 %v1296_v7, 1e-24 }
 0x314   :  { %1830 = vst [vmem:[#allocation7 + $0x40] sm:$0xff] %v1401_v14  ;;  %v1402_v33 = vmul.f32 %v2819_v34, %v3519_v11  ;;  %v1298_v41 = vpop.xlane.xlu0 %1297 }
 0x315   :  { %v2821_v62 = vpop.eup %2820  ;;  %2830 = vrsqrt.f32 %v1344_v55  ;;  %v1345_v51 = vmax.f32 %v1298_v41, 1e-24 }
 0x316   :  { %1831 = vst [vmem:[#allocation7 + $0x48] sm:$0xff] %v1402_v33  ;;  %v1403_v44 = vmul.f32 %v2821_v62, %v3556_v43  ;;  %v1300_v36 = vpop.xlane.xlu1 %1299 }
 0x317   :  { %v2823_v54 = vpop.eup %2822  ;;  %2832 = vrsqrt.f32 %v1345_v51  ;;  %v1346_v45 = vmax.f32 %v1300_v36, 1e-24 }
 0x318   :  { %1832 = vst [vmem:[#allocation7 + $0x50] sm:$0xff] %v1403_v44  ;;  %v1404_v0 = vmul.f32 %v2823_v54, %v3561_v37  ;;  %v1302_v18 = vpop.xlane.xlu0 %1301 }
 0x319   :  { %v2825_v15 = vpop.eup %2824  ;;  %2834 = vrsqrt.f32 %v1346_v45  ;;  %v1347_v28 = vmax.f32 %v1302_v18, 1e-24 }
 0x31a   :  { %1833 = vst [vmem:[#allocation7 + $0x58] sm:$0xff] %v1404_v0  ;;  %v1405_v11 = vmul.f32 %v2825_v15, %v3586_v60  ;;  %v1304_v21 = vpop.xlane.xlu1 %1303 }
 0x31b   :  { %v2827_v61 = vpop.eup %2826  ;;  %2836 = vrsqrt.f32 %v1347_v28  ;;  %v1348_v63 = vmax.f32 %v1304_v21, 1e-24 }
 0x31c   :  { %1834 = vst [vmem:[#allocation7 + $0x60] sm:$0xff] %v1405_v11  ;;  %v1406_v43 = vmul.f32 %v2827_v61, %v3591_v27  ;;  %v1306_v17 = vpop.xlane.xlu0 %1305 }
 0x31d   :  { %v2829_v26 = vpop.eup %2828  ;;  %2838 = vrsqrt.f32 %v1348_v63  ;;  %v1349_v48 = vmax.f32 %v1306_v17, 1e-24 }
 0x31e   :  { %1835 = vst [vmem:[#allocation7 + $0x68] sm:$0xff] %v1406_v43  ;;  %v1407_v37 = vmul.f32 %v2829_v26, %v3616_v59  ;;  %v1308_v40 = vpop.xlane.xlu1 %1307  ;;  %v4214_v26 = vld [vmem:[#allocation13_spill] sm:$0xff] }
 0x31f   :  { %v2831_v1 = vpop.eup %2830  ;;  %2840 = vrsqrt.f32 %v1349_v48  ;;  %v1350_v23 = vmax.f32 %v1308_v40, 1e-24  ;;  %v4215_v48 = vsub.s32 0, %v4214_v26 }
 0x320   :  { %1836 = vst [vmem:[#allocation7 + $0x70] sm:$0xff] %v1407_v37  ;;  %v1408_v60 = vmul.f32 %v2831_v1, %v3621_v13  ;;  %v1310_v47 = vpop.xlane.xlu0 %1309  ;;  %v4216_v37 = vsub.s32 1, %v4214_v26 }
 0x321   :  { %v2833_v16 = vpop.eup %2832  ;;  %2842 = vrsqrt.f32 %v1350_v23  ;;  %v1351_v32 = vmax.f32 %v1310_v47, 1e-24 }
 0x322   :  { %1837 = vst [vmem:[#allocation7 + $0x78] sm:$0xff] %v1408_v60  ;;  %v1409_v27 = vmul.f32 %v2833_v16, %v3646_v30  ;;  %v1312_v42 = vpop.xlane.xlu1 %1311 }
 0x323   :  { %v2835_v24 = vpop.eup %2834  ;;  %2844 = vrsqrt.f32 %v1351_v32  ;;  %v1352_v29 = vmax.f32 %v1312_v42, 1e-24 }
 0x324   :  { %1838 = vst [vmem:[#allocation7 + $0x80] sm:$0xff] %v1409_v27  ;;  %v1410_v59 = vmul.f32 %v2835_v24, %v3651_v6  ;;  %v1314_v8 = vpop.xlane.xlu0 %1313 }
 0x325   :  { %v2837_v20 = vpop.eup %2836  ;;  %2846 = vrsqrt.f32 %v1352_v29  ;;  %v1353_v49 = vmax.f32 %v1314_v8, 1e-24 }
 0x326   :  { %1839 = vst [vmem:[#allocation7 + $0x88] sm:$0xff] %v1410_v59  ;;  %v1411_v13 = vmul.f32 %v2837_v20, %v3676_v52  ;;  %v1316_v50 = vpop.xlane.xlu1 %1315 }
 0x327   :  { %v2839_v57 = vpop.eup %2838  ;;  %2848 = vrsqrt.f32 %v1353_v49  ;;  %v1354_v12 = vmax.f32 %v1316_v50, 1e-24 }
 0x328   :  { %1840 = vst [vmem:[#allocation7 + $0x90] sm:$0xff] %v1411_v13  ;;  %v1412_v30 = vmul.f32 %v2839_v57, %v3681_v19  ;;  %v1318_v4 = vpop.xlane.xlu0 %1317 }
 0x329   :  { %v2841_v3 = vpop.eup %2840  ;;  %2850 = vrsqrt.f32 %v1354_v12  ;;  %v1355_v35 = vmax.f32 %v1318_v4, 1e-24 }
 0x32a   :  { %1841 = vst [vmem:[#allocation7 + $0x98] sm:$0xff] %v1412_v30  ;;  %v1413_v6 = vmul.f32 %v2841_v3, %v3706_v9  ;;  %v1320_v25 = vpop.xlane.xlu1 %1319 }
 0x32b   :  { %v2843_v14 = vpop.eup %2842  ;;  %2852 = vrsqrt.f32 %v1355_v35  ;;  %v1356_v7 = vmax.f32 %v1320_v25, 1e-24 }
 0x32c   :  { %1842 = vst [vmem:[#allocation7 + $0xa0] sm:$0xff] %v1413_v6  ;;  %v1414_v52 = vmul.f32 %v2843_v14, %v3711_v53  ;;  %v1322_v34 = vpop.xlane.xlu0 %1321 }
 0x32d   :  { %v2845_v55 = vpop.eup %2844  ;;  %2854 = vrsqrt.f32 %v1356_v7  ;;  %v1357_v33 = vmax.f32 %v1322_v34, 1e-24 }
 0x32e   :  { %1843 = vst [vmem:[#allocation7 + $0xa8] sm:$0xff] %v1414_v52  ;;  %v1415_v19 = vmul.f32 %v2845_v55, %v3736_v38  ;;  %v1324_v41 = vpop.xlane.xlu1 %1323 }
 0x32f   :  { %v2847_v62 = vpop.eup %2846  ;;  %2856 = vrsqrt.f32 %v1357_v33  ;;  %v1358_v51 = vmax.f32 %v1324_v41, 1e-24 }
 0x330   :  { %1844 = vst [vmem:[#allocation7 + $0xb0] sm:$0xff] %v1415_v19  ;;  %v1416_v9 = vmul.f32 %v2847_v62, %v3741_v5  ;;  %v1326_v44 = vpop.xlane.xlu0 %1325 }
 0x331   :  { %v2849_v36 = vpop.eup %2848  ;;  %2858 = vrsqrt.f32 %v1358_v51  ;;  %v1359_v54 = vmax.f32 %v1326_v44, 1e-24 }
 0x332   :  { %1845 = vst [vmem:[#allocation7 + $0xb8] sm:$0xff] %v1416_v9  ;;  %v1417_v53 = vmul.f32 %v2849_v36, %v3762_v10  ;;  %v1328_v45 = vpop.xlane.xlu1 %1327 }
 0x333   :  { %v2851_v0 = vpop.eup %2850  ;;  %2860 = vrsqrt.f32 %v1359_v54  ;;  %v1360_v18 = vmax.f32 %v1328_v45, 1e-24 }
 0x334   :  { %1846 = vst [vmem:[#allocation7 + $0xc0] sm:$0xff] %v1417_v53  ;;  %v1418_v38 = vmul.f32 %v2851_v0, %v3767_v31 }
 0x335   :  { %v2853_v15 = vpop.eup %2852  ;;  %2862 = vrsqrt.f32 %v1360_v18 }
 0x336   :  { %1847 = vst [vmem:[#allocation7 + $0xc8] sm:$0xff] %v1418_v38  ;;  %v1419_v28 = vmul.f32 %v2853_v15, %v3788_v22 }
 0x337   :  { %v2855_v5 = vpop.eup %2854 }
 0x338   :  { %1848 = vst [vmem:[#allocation7 + $0xd0] sm:$0xff] %v1419_v28  ;;  %v1420_v11 = vmul.f32 %v2855_v5, %v3793_v58  ;;  %v1473_v58 = vld [vmem:[%s4165_s8] sm:$0x3]  ;;  %s2959_s8 = smov [#allocation8]  }
 0x339   :  { %v2857_v21 = vpop.eup %2856  ;;  %s2296_s28 = sshll.u32 %s2959_s8, 4  ;;  %s2297_s28 = int_to_ptr.vmem [resolvable:$true] %s2296_s28 }
 0x33a   :  { %1849 = vst [vmem:[#allocation7 + $0xd8] sm:$0xff] %v1420_v11  ;;  %v1421_v10 = vmul.f32 %v2857_v21, %v3812_v39  ;;  %v4012_v39 = vrot.slane %v1473_v58, %v4215_v48  ;;  %s2864_s29 = scalar_lea.vmem %s2297_s28, 4096  ;;  %p2869_p1 = scmp.lt.s32.totalorder %s2297_s28, %s2297_s28 }
 0x33b   :  { %v2859_v61 = vpop.eup %2858  ;;  %p2865_p0 = scmp.ne.s32.totalorder %s2297_s28, %s2864_s29  ;;  %p2870_p2 = scmp.lt.s32.totalorder %s2864_s29, %s2864_s29 }
 0x33c   :  { %1850 = vst [vmem:[#allocation7 + $0xe0] sm:$0xff] %v1421_v10  ;;  %v1422_v63 = vmul.f32 %v2859_v61, %v3815_v46  ;;  %v4016_v46 = vrot.slane %v1473_v58, %v4216_v37 }
 0x33d   :  { %v2861_v43 = vpop.eup %2860  ;;  %p2871_p3 = por %p2870_p2, %p2869_p1 }
 0x33e   :  { %1851 = vst [vmem:[#allocation7 + $0xe8] sm:$0xff] %v1422_v63  ;;  %v1423_v31 = vmul.f32 %v2861_v43, %v3834_v2 }
 0x33f   :  { %v2863_v17 = vpop.eup %2862  ;;  %p2872_p4 = pnand %p2871_p3, %p2865_p0 }
 0x340   :  { %1852 = vst [vmem:[#allocation7 + $0xf0] sm:$0xff] %v1423_v31  ;;  %v1424_v22 = vmul.f32 %v2863_v17, %v3837_v56 }
 0x342   :  { %1853 = vst [vmem:[#allocation7 + $0xf8] sm:$0xff] %v1424_v22 }
 0x361   :  { %v1599_v40 = vpop.f32.mrb[64].mxu0  ;;  %v2032_v1 = vpop.f32.mrb[64].mxu1 }
 0x362   :  { %v1600_v2 = vadd.f32 %v1599_v40, %v4012_v39  ;;  %2191 = vst [vmem:[#allocation3] sm:$0xff] %v2032_v1  ;;  %v1601_v23 = vpop.f32.mrb[65].mxu0  ;;  %v2034_v56 = vpop.f32.mrb[65].mxu1 }
 0x363   :  { %v1602_v60 = vadd.f32 %v1601_v23, %v4016_v46  ;;  %2192 = vst [vmem:[#allocation3 + $0x8] sm:$0xff] %v2034_v56  ;;  %v1603_v47 = vpop.f32.mrb[66].mxu0  ;;  %v2036_v16 = vpop.f32.mrb[66].mxu1 }
 0x364   :  { %1758 = vst [vmem:[#allocation5] sm:$0xff] %v1600_v2  ;;  %v1604_v32 = vadd.f32 %v1603_v47, %v4012_v39  ;;  %2193 = vst [vmem:[#allocation3 + $0x10] sm:$0xff] %v2036_v16  ;;  %v1605_v27 = vpop.f32.mrb[67].mxu0  ;;  %v2038_v42 = vpop.f32.mrb[67].mxu1 }
 0x365   :  { %1759 = vst [vmem:[#allocation5 + $0x8] sm:$0xff] %v1602_v60  ;;  %v1606_v24 = vadd.f32 %v1605_v27, %v4016_v46  ;;  %2194 = vst [vmem:[#allocation3 + $0x18] sm:$0xff] %v2038_v42 }
 0x366   :  { %1760 = vst [vmem:[#allocation5 + $0x10] sm:$0xff] %v1604_v32 }
 0x367   :  { %1761 = vst [vmem:[#allocation5 + $0x18] sm:$0xff] %v1606_v24 }
 0x368   :  { %2875 = shalt.err (!%p2872_p4)
}
 0x369   :  { %s2876_s6 = scalar_lea.hbm %s4169_s12, 4096 }
 0x36a   :  { %p2877_p5 = scmp.ne.s32.totalorder %s4169_s12, %s2876_s6  ;;  %p2880_p6 = scmp.lt.u32.totalorder %s2876_s6, %s4169_s12 }
 0x36c   :  { %p2882_p7 = pnand %p2880_p6, %p2877_p5 }
 0x36e   :  { %2885 = shalt.err (!%p2882_p7)
}
 0x36f   :  { %s2960_s16 = smov 128   ;;  %s2961_s17 = smov 8   ;;  %v1609_v29 = vpop.f32.mrb[68].mxu0  ;;  %v2042_v59 = vpop.f32.mrb[68].mxu1 }
 0x370   :  { %2302 = dma.vmem_to_hbm [thread:$0]  %s2297_s28, 4096, %s4169_s12, [#allocation9], %s2960_s16, %s2960_s16, %s2961_s17   ;;  %v1610_v8 = vadd.f32 %v1609_v29, %v4012_v39  ;;  %2195 = vst [vmem:[#allocation3 + $0x20] sm:$0xff] %v2042_v59  ;;  %v1611_v20 = vpop.f32.mrb[69].mxu0  ;;  %v2044_v49 = vpop.f32.mrb[69].mxu1 }
 0x371   :  { %v1612_v13 = vadd.f32 %v1611_v20, %v4016_v46  ;;  %2196 = vst [vmem:[#allocation3 + $0x28] sm:$0xff] %v2044_v49  ;;  %v1613_v50 = vpop.f32.mrb[70].mxu0  ;;  %v2046_v57 = vpop.f32.mrb[70].mxu1  ;;  %s2962_s12 = smov [#allocation3]   ;;  %s2963_s19 = smov [#allocation5]  }
 0x372   :  { %1762 = vst [vmem:[#allocation5 + $0x20] sm:$0xff] %v1610_v8  ;;  %v1614_v12 = vadd.f32 %v1613_v50, %v4012_v39  ;;  %2197 = vst [vmem:[#allocation3 + $0x30] sm:$0xff] %v2046_v57  ;;  %v1615_v30 = vpop.f32.mrb[71].mxu0  ;;  %v2048_v4 = vpop.f32.mrb[71].mxu1  ;;  %s2260_s4 = sshll.u32 %s2962_s12, 4  ;;  %s2272_s20 = sshll.u32 %s2963_s19, 4  ;;  %s4095_s4 = int_to_ptr.vmem [resolvable:$true] %s2260_s4  ;;  %s4099_s20 = int_to_ptr.vmem [resolvable:$true] %s2272_s20 }
 0x373   :  { %1763 = vst [vmem:[#allocation5 + $0x28] sm:$0xff] %v1612_v13  ;;  %v1616_v3 = vadd.f32 %v1615_v30, %v4016_v46  ;;  %2198 = vst [vmem:[#allocation3 + $0x38] sm:$0xff] %v2048_v4  ;;  %v1619_v35 = vpop.f32.mrb[72].mxu0  ;;  %v2052_v6 = vpop.f32.mrb[72].mxu1  ;;  %s2964_s21 = smov [#allocation7]   ;;  %s2886_s23 = scalar_lea.vmem %s4095_s4, 8192 }
 0x374   :  { %1764 = vst [vmem:[#allocation5 + $0x30] sm:$0xff] %v1614_v12  ;;  %v1620_v25 = vadd.f32 %v1619_v35, %v4012_v39  ;;  %2199 = vst [vmem:[#allocation3 + $0x40] sm:$0xff] %v2052_v6  ;;  %v1621_v14 = vpop.f32.mrb[73].mxu0  ;;  %v2054_v7 = vpop.f32.mrb[73].mxu1  ;;  %s2284_s22 = sshll.u32 %s2964_s21, 4  ;;  %p2887_p8 = scmp.ne.s32.totalorder %s4095_s4, %s2886_s23  ;;  %s4101_s22 = int_to_ptr.vmem [resolvable:$true] %s2284_s22 }
 0x375   :  { %1765 = vst [vmem:[#allocation5 + $0x38] sm:$0xff] %v1616_v3  ;;  %v1622_v52 = vadd.f32 %v1621_v14, %v4016_v46  ;;  %2200 = vst [vmem:[#allocation3 + $0x48] sm:$0xff] %v2054_v7  ;;  %v1623_v34 = vpop.f32.mrb[74].mxu0  ;;  %v2056_v55 = vpop.f32.mrb[74].mxu1  ;;  %p2891_p9 = scmp.lt.s32.totalorder %s4095_s4, %s4095_s4  ;;  %p2892_p10 = scmp.lt.s32.totalorder %s2886_s23, %s2886_s23 }
 0x376   :  { %1766 = vst [vmem:[#allocation5 + $0x40] sm:$0xff] %v1620_v25  ;;  %v1624_v33 = vadd.f32 %v1623_v34, %v4012_v39  ;;  %2201 = vst [vmem:[#allocation3 + $0x50] sm:$0xff] %v2056_v55  ;;  %v1625_v19 = vpop.f32.mrb[75].mxu0  ;;  %v2058_v41 = vpop.f32.mrb[75].mxu1 }
 0x377   :  { %1767 = vst [vmem:[#allocation5 + $0x48] sm:$0xff] %v1622_v52  ;;  %v1626_v62 = vadd.f32 %v1625_v19, %v4016_v46  ;;  %2202 = vst [vmem:[#allocation3 + $0x58] sm:$0xff] %v2058_v41  ;;  %p2893_p11 = por %p2892_p10, %p2891_p9 }
 0x378   :  { %1768 = vst [vmem:[#allocation5 + $0x50] sm:$0xff] %v1624_v33 }
 0x379   :  { %1769 = vst [vmem:[#allocation5 + $0x58] sm:$0xff] %v1626_v62  ;;  %v1629_v51 = vpop.f32.mrb[76].mxu0  ;;  %v2062_v9 = vpop.f32.mrb[76].mxu1  ;;  %p2894_p12 = pnand %p2893_p11, %p2887_p8 }
 0x37a   :  { %v1630_v44 = vadd.f32 %v1629_v51, %v4012_v39  ;;  %2203 = vst [vmem:[#allocation3 + $0x60] sm:$0xff] %v2062_v9  ;;  %v1631_v36 = vpop.f32.mrb[77].mxu0  ;;  %v2064_v54 = vpop.f32.mrb[77].mxu1 }
 0x37b   :  { %v1632_v53 = vadd.f32 %v1631_v36, %v4016_v46  ;;  %2204 = vst [vmem:[#allocation3 + $0x68] sm:$0xff] %v2064_v54  ;;  %v1633_v45 = vpop.f32.mrb[78].mxu0  ;;  %v2066_v0 = vpop.f32.mrb[78].mxu1 }
 0x37c   :  { %1770 = vst [vmem:[#allocation5 + $0x60] sm:$0xff] %v1630_v44  ;;  %v1634_v18 = vadd.f32 %v1633_v45, %v4012_v39  ;;  %2205 = vst [vmem:[#allocation3 + $0x70] sm:$0xff] %v2066_v0  ;;  %v1635_v38 = vpop.f32.mrb[79].mxu0  ;;  %v2068_v15 = vpop.f32.mrb[79].mxu1 }
 0x37d   :  { %1771 = vst [vmem:[#allocation5 + $0x68] sm:$0xff] %v1632_v53  ;;  %v1636_v28 = vadd.f32 %v1635_v38, %v4016_v46  ;;  %2206 = vst [vmem:[#allocation3 + $0x78] sm:$0xff] %v2068_v15 }
 0x37e   :  { %1772 = vst [vmem:[#allocation5 + $0x70] sm:$0xff] %v1634_v18 }
 0x37f   :  { %1773 = vst [vmem:[#allocation5 + $0x78] sm:$0xff] %v1636_v28 }
 0x381   :  { %v1639_v5 = vpop.f32.mrb[80].mxu0  ;;  %v2072_v11 = vpop.f32.mrb[80].mxu1 }
 0x382   :  { %v1640_v21 = vadd.f32 %v1639_v5, %v4012_v39  ;;  %2207 = vst [vmem:[#allocation3 + $0x80] sm:$0xff] %v2072_v11  ;;  %v1641_v10 = vpop.f32.mrb[81].mxu0  ;;  %v2074_v61 = vpop.f32.mrb[81].mxu1 }
 0x383   :  { %v1642_v63 = vadd.f32 %v1641_v10, %v4016_v46  ;;  %2208 = vst [vmem:[#allocation3 + $0x88] sm:$0xff] %v2074_v61  ;;  %v1643_v43 = vpop.f32.mrb[82].mxu0  ;;  %v2076_v31 = vpop.f32.mrb[82].mxu1 }
 0x384   :  { %1774 = vst [vmem:[#allocation5 + $0x80] sm:$0xff] %v1640_v21  ;;  %v1644_v17 = vadd.f32 %v1643_v43, %v4012_v39  ;;  %2209 = vst [vmem:[#allocation3 + $0x90] sm:$0xff] %v2076_v31  ;;  %v1645_v22 = vpop.f32.mrb[83].mxu0  ;;  %v2078_v58 = vpop.f32.mrb[83].mxu1 }
 0x385   :  { %1775 = vst [vmem:[#allocation5 + $0x88] sm:$0xff] %v1642_v63  ;;  %v1646_v26 = vadd.f32 %v1645_v22, %v4016_v46  ;;  %2210 = vst [vmem:[#allocation3 + $0x98] sm:$0xff] %v2078_v58 }
 0x386   :  { %1776 = vst [vmem:[#allocation5 + $0x90] sm:$0xff] %v1644_v17 }
 0x387   :  { %1777 = vst [vmem:[#allocation5 + $0x98] sm:$0xff] %v1646_v26 }
 0x389   :  { %v1649_v48 = vpop.f32.mrb[84].mxu0  ;;  %v2082_v37 = vpop.f32.mrb[84].mxu1 }
 0x38a   :  { %v1650_v40 = vadd.f32 %v1649_v48, %v4012_v39  ;;  %2211 = vst [vmem:[#allocation3 + $0xa0] sm:$0xff] %v2082_v37  ;;  %v1651_v1 = vpop.f32.mrb[85].mxu0  ;;  %v2084_v2 = vpop.f32.mrb[85].mxu1 }
 0x38b   :  { %v1652_v23 = vadd.f32 %v1651_v1, %v4016_v46  ;;  %2212 = vst [vmem:[#allocation3 + $0xa8] sm:$0xff] %v2084_v2  ;;  %v1653_v56 = vpop.f32.mrb[86].mxu0  ;;  %v2086_v60 = vpop.f32.mrb[86].mxu1 }
 0x38c   :  { %1778 = vst [vmem:[#allocation5 + $0xa0] sm:$0xff] %v1650_v40  ;;  %v1654_v47 = vadd.f32 %v1653_v56, %v4012_v39  ;;  %2213 = vst [vmem:[#allocation3 + $0xb0] sm:$0xff] %v2086_v60  ;;  %v1655_v16 = vpop.f32.mrb[87].mxu0  ;;  %v2088_v32 = vpop.f32.mrb[87].mxu1 }
 0x38d   :  { %1779 = vst [vmem:[#allocation5 + $0xa8] sm:$0xff] %v1652_v23  ;;  %v1656_v27 = vadd.f32 %v1655_v16, %v4016_v46  ;;  %2214 = vst [vmem:[#allocation3 + $0xb8] sm:$0xff] %v2088_v32 }
 0x38e   :  { %1780 = vst [vmem:[#allocation5 + $0xb0] sm:$0xff] %v1654_v47 }
 0x38f   :  { %1781 = vst [vmem:[#allocation5 + $0xb8] sm:$0xff] %v1656_v27 }
 0x391   :  { %v1659_v42 = vpop.f32.mrb[88].mxu0  ;;  %v2092_v24 = vpop.f32.mrb[88].mxu1 }
 0x392   :  { %v1660_v29 = vadd.f32 %v1659_v42, %v4012_v39  ;;  %2215 = vst [vmem:[#allocation3 + $0xc0] sm:$0xff] %v2092_v24  ;;  %v1661_v59 = vpop.f32.mrb[89].mxu0  ;;  %v2094_v8 = vpop.f32.mrb[89].mxu1 }
 0x393   :  { %v1662_v20 = vadd.f32 %v1661_v59, %v4016_v46  ;;  %2216 = vst [vmem:[#allocation3 + $0xc8] sm:$0xff] %v2094_v8  ;;  %v1663_v49 = vpop.f32.mrb[90].mxu0  ;;  %v2096_v13 = vpop.f32.mrb[90].mxu1 }
 0x394   :  { %1782 = vst [vmem:[#allocation5 + $0xc0] sm:$0xff] %v1660_v29  ;;  %v1664_v50 = vadd.f32 %v1663_v49, %v4012_v39  ;;  %2217 = vst [vmem:[#allocation3 + $0xd0] sm:$0xff] %v2096_v13  ;;  %v1665_v57 = vpop.f32.mrb[91].mxu0  ;;  %v2098_v12 = vpop.f32.mrb[91].mxu1 }
 0x395   :  { %1783 = vst [vmem:[#allocation5 + $0xc8] sm:$0xff] %v1662_v20  ;;  %v1666_v30 = vadd.f32 %v1665_v57, %v4016_v46  ;;  %2218 = vst [vmem:[#allocation3 + $0xd8] sm:$0xff] %v2098_v12 }
 0x396   :  { %1784 = vst [vmem:[#allocation5 + $0xd0] sm:$0xff] %v1664_v50 }
 0x397   :  { %1785 = vst [vmem:[#allocation5 + $0xd8] sm:$0xff] %v1666_v30 }
 0x399   :  { %v1669_v4 = vpop.f32.mrb[92].mxu0  ;;  %v2102_v3 = vpop.f32.mrb[92].mxu1 }
 0x39a   :  { %v1670_v35 = vadd.f32 %v1669_v4, %v4012_v39  ;;  %2219 = vst [vmem:[#allocation3 + $0xe0] sm:$0xff] %v2102_v3  ;;  %v1671_v6 = vpop.f32.mrb[93].mxu0  ;;  %v2104_v25 = vpop.f32.mrb[93].mxu1 }
 0x39b   :  { %v1672_v14 = vadd.f32 %v1671_v6, %v4016_v46  ;;  %2220 = vst [vmem:[#allocation3 + $0xe8] sm:$0xff] %v2104_v25  ;;  %v1673_v7 = vpop.f32.mrb[94].mxu0  ;;  %v2106_v52 = vpop.f32.mrb[94].mxu1 }
 0x39c   :  { %1786 = vst [vmem:[#allocation5 + $0xe0] sm:$0xff] %v1670_v35  ;;  %v1674_v34 = vadd.f32 %v1673_v7, %v4012_v39  ;;  %2221 = vst [vmem:[#allocation3 + $0xf0] sm:$0xff] %v2106_v52  ;;  %v1675_v55 = vpop.f32.mrb[95].mxu0  ;;  %v2108_v33 = vpop.f32.mrb[95].mxu1 }
 0x39d   :  { %1787 = vst [vmem:[#allocation5 + $0xe8] sm:$0xff] %v1672_v14  ;;  %v1676_v19 = vadd.f32 %v1675_v55, %v4016_v46  ;;  %2222 = vst [vmem:[#allocation3 + $0xf8] sm:$0xff] %v2108_v33 }
 0x39e   :  { %1788 = vst [vmem:[#allocation5 + $0xf0] sm:$0xff] %v1674_v34 }
 0x39f   :  { %1789 = vst [vmem:[#allocation5 + $0xf8] sm:$0xff] %v1676_v19 }
 0x3a1   :  { %v1679_v41 = vpop.f32.mrb[96].mxu0  ;;  %v2112_v62 = vpop.f32.mrb[96].mxu1 }
 0x3a2   :  { %v1680_v51 = vadd.f32 %v1679_v41, %v4012_v39  ;;  %2223 = vst [vmem:[#allocation3 + $0x100] sm:$0xff] %v2112_v62  ;;  %v1681_v9 = vpop.f32.mrb[97].mxu0  ;;  %v2114_v44 = vpop.f32.mrb[97].mxu1 }
 0x3a3   :  { %v1682_v36 = vadd.f32 %v1681_v9, %v4016_v46  ;;  %2224 = vst [vmem:[#allocation3 + $0x108] sm:$0xff] %v2114_v44  ;;  %v1683_v54 = vpop.f32.mrb[98].mxu0  ;;  %v2116_v53 = vpop.f32.mrb[98].mxu1 }
 0x3a4   :  { %1790 = vst [vmem:[#allocation5 + $0x100] sm:$0xff] %v1680_v51  ;;  %v1684_v45 = vadd.f32 %v1683_v54, %v4012_v39  ;;  %2225 = vst [vmem:[#allocation3 + $0x110] sm:$0xff] %v2116_v53  ;;  %v1685_v0 = vpop.f32.mrb[99].mxu0  ;;  %v2118_v18 = vpop.f32.mrb[99].mxu1 }
 0x3a5   :  { %1791 = vst [vmem:[#allocation5 + $0x108] sm:$0xff] %v1682_v36  ;;  %v1686_v38 = vadd.f32 %v1685_v0, %v4016_v46  ;;  %2226 = vst [vmem:[#allocation3 + $0x118] sm:$0xff] %v2118_v18 }
 0x3a6   :  { %1792 = vst [vmem:[#allocation5 + $0x110] sm:$0xff] %v1684_v45 }
 0x3a7   :  { %1793 = vst [vmem:[#allocation5 + $0x118] sm:$0xff] %v1686_v38 }
 0x3a9   :  { %v1689_v15 = vpop.f32.mrb[100].mxu0  ;;  %v2122_v28 = vpop.f32.mrb[100].mxu1 }
 0x3aa   :  { %v1690_v5 = vadd.f32 %v1689_v15, %v4012_v39  ;;  %2227 = vst [vmem:[#allocation3 + $0x120] sm:$0xff] %v2122_v28  ;;  %v1691_v11 = vpop.f32.mrb[101].mxu0  ;;  %v2124_v21 = vpop.f32.mrb[101].mxu1 }
 0x3ab   :  { %v1692_v10 = vadd.f32 %v1691_v11, %v4016_v46  ;;  %2228 = vst [vmem:[#allocation3 + $0x128] sm:$0xff] %v2124_v21  ;;  %v1693_v61 = vpop.f32.mrb[102].mxu0  ;;  %v2126_v63 = vpop.f32.mrb[102].mxu1 }
 0x3ac   :  { %1794 = vst [vmem:[#allocation5 + $0x120] sm:$0xff] %v1690_v5  ;;  %v1694_v43 = vadd.f32 %v1693_v61, %v4012_v39  ;;  %2229 = vst [vmem:[#allocation3 + $0x130] sm:$0xff] %v2126_v63  ;;  %v1695_v31 = vpop.f32.mrb[103].mxu0  ;;  %v2128_v17 = vpop.f32.mrb[103].mxu1 }
 0x3ad   :  { %1795 = vst [vmem:[#allocation5 + $0x128] sm:$0xff] %v1692_v10  ;;  %v1696_v22 = vadd.f32 %v1695_v31, %v4016_v46  ;;  %2230 = vst [vmem:[#allocation3 + $0x138] sm:$0xff] %v2128_v17 }
 0x3ae   :  { %1796 = vst [vmem:[#allocation5 + $0x130] sm:$0xff] %v1694_v43 }
 0x3af   :  { %1797 = vst [vmem:[#allocation5 + $0x138] sm:$0xff] %v1696_v22 }
 0x3b1   :  { %v1699_v58 = vpop.f32.mrb[104].mxu0  ;;  %v2132_v26 = vpop.f32.mrb[104].mxu1 }
 0x3b2   :  { %v1700_v48 = vadd.f32 %v1699_v58, %v4012_v39  ;;  %2231 = vst [vmem:[#allocation3 + $0x140] sm:$0xff] %v2132_v26  ;;  %v1701_v37 = vpop.f32.mrb[105].mxu0  ;;  %v2134_v40 = vpop.f32.mrb[105].mxu1 }
 0x3b3   :  { %v1702_v1 = vadd.f32 %v1701_v37, %v4016_v46  ;;  %2232 = vst [vmem:[#allocation3 + $0x148] sm:$0xff] %v2134_v40  ;;  %v1703_v2 = vpop.f32.mrb[106].mxu0  ;;  %v2136_v23 = vpop.f32.mrb[106].mxu1 }
 0x3b4   :  { %1798 = vst [vmem:[#allocation5 + $0x140] sm:$0xff] %v1700_v48  ;;  %v1704_v56 = vadd.f32 %v1703_v2, %v4012_v39  ;;  %2233 = vst [vmem:[#allocation3 + $0x150] sm:$0xff] %v2136_v23  ;;  %v1705_v60 = vpop.f32.mrb[107].mxu0  ;;  %v2138_v47 = vpop.f32.mrb[107].mxu1 }
 0x3b5   :  { %1799 = vst [vmem:[#allocation5 + $0x148] sm:$0xff] %v1702_v1  ;;  %v1706_v16 = vadd.f32 %v1705_v60, %v4016_v46  ;;  %2234 = vst [vmem:[#allocation3 + $0x158] sm:$0xff] %v2138_v47 }
 0x3b6   :  { %1800 = vst [vmem:[#allocation5 + $0x150] sm:$0xff] %v1704_v56 }
 0x3b7   :  { %1801 = vst [vmem:[#allocation5 + $0x158] sm:$0xff] %v1706_v16 }
 0x3b9   :  { %v1709_v32 = vpop.f32.mrb[108].mxu0  ;;  %v2142_v27 = vpop.f32.mrb[108].mxu1 }
 0x3ba   :  { %v1710_v42 = vadd.f32 %v1709_v32, %v4012_v39  ;;  %2235 = vst [vmem:[#allocation3 + $0x160] sm:$0xff] %v2142_v27  ;;  %v1711_v24 = vpop.f32.mrb[109].mxu0  ;;  %v2144_v29 = vpop.f32.mrb[109].mxu1 }
 0x3bb   :  { %v1712_v59 = vadd.f32 %v1711_v24, %v4016_v46  ;;  %2236 = vst [vmem:[#allocation3 + $0x168] sm:$0xff] %v2144_v29  ;;  %v1713_v8 = vpop.f32.mrb[110].mxu0  ;;  %v2146_v20 = vpop.f32.mrb[110].mxu1 }
 0x3bc   :  { %1802 = vst [vmem:[#allocation5 + $0x160] sm:$0xff] %v1710_v42  ;;  %v1714_v49 = vadd.f32 %v1713_v8, %v4012_v39  ;;  %2237 = vst [vmem:[#allocation3 + $0x170] sm:$0xff] %v2146_v20  ;;  %v1715_v13 = vpop.f32.mrb[111].mxu0  ;;  %v2148_v50 = vpop.f32.mrb[111].mxu1 }
 0x3bd   :  { %1803 = vst [vmem:[#allocation5 + $0x168] sm:$0xff] %v1712_v59  ;;  %v1716_v57 = vadd.f32 %v1715_v13, %v4016_v46  ;;  %2238 = vst [vmem:[#allocation3 + $0x178] sm:$0xff] %v2148_v50 }
 0x3be   :  { %1804 = vst [vmem:[#allocation5 + $0x170] sm:$0xff] %v1714_v49 }
 0x3bf   :  { %1805 = vst [vmem:[#allocation5 + $0x178] sm:$0xff] %v1716_v57 }
 0x3c1   :  { %v1719_v12 = vpop.f32.mrb[112].mxu0  ;;  %v2152_v30 = vpop.f32.mrb[112].mxu1 }
 0x3c2   :  { %v1720_v4 = vadd.f32 %v1719_v12, %v4012_v39  ;;  %2239 = vst [vmem:[#allocation3 + $0x180] sm:$0xff] %v2152_v30  ;;  %v1721_v3 = vpop.f32.mrb[113].mxu0  ;;  %v2154_v35 = vpop.f32.mrb[113].mxu1 }
 0x3c3   :  { %v1722_v6 = vadd.f32 %v1721_v3, %v4016_v46  ;;  %2240 = vst [vmem:[#allocation3 + $0x188] sm:$0xff] %v2154_v35  ;;  %v1723_v25 = vpop.f32.mrb[114].mxu0  ;;  %v2156_v14 = vpop.f32.mrb[114].mxu1 }
 0x3c4   :  { %1806 = vst [vmem:[#allocation5 + $0x180] sm:$0xff] %v1720_v4  ;;  %v1724_v7 = vadd.f32 %v1723_v25, %v4012_v39  ;;  %2241 = vst [vmem:[#allocation3 + $0x190] sm:$0xff] %v2156_v14  ;;  %v1725_v52 = vpop.f32.mrb[115].mxu0  ;;  %v2158_v34 = vpop.f32.mrb[115].mxu1 }
 0x3c5   :  { %1807 = vst [vmem:[#allocation5 + $0x188] sm:$0xff] %v1722_v6  ;;  %v1726_v55 = vadd.f32 %v1725_v52, %v4016_v46  ;;  %2242 = vst [vmem:[#allocation3 + $0x198] sm:$0xff] %v2158_v34 }
 0x3c6   :  { %1808 = vst [vmem:[#allocation5 + $0x190] sm:$0xff] %v1724_v7 }
 0x3c7   :  { %1809 = vst [vmem:[#allocation5 + $0x198] sm:$0xff] %v1726_v55 }
 0x3c9   :  { %v1729_v33 = vpop.f32.mrb[116].mxu0  ;;  %v2162_v19 = vpop.f32.mrb[116].mxu1 }
 0x3ca   :  { %v1730_v41 = vadd.f32 %v1729_v33, %v4012_v39  ;;  %2243 = vst [vmem:[#allocation3 + $0x1a0] sm:$0xff] %v2162_v19  ;;  %v1731_v62 = vpop.f32.mrb[117].mxu0  ;;  %v2164_v51 = vpop.f32.mrb[117].mxu1 }
 0x3cb   :  { %v1732_v9 = vadd.f32 %v1731_v62, %v4016_v46  ;;  %2244 = vst [vmem:[#allocation3 + $0x1a8] sm:$0xff] %v2164_v51  ;;  %v1733_v44 = vpop.f32.mrb[118].mxu0  ;;  %v2166_v36 = vpop.f32.mrb[118].mxu1 }
 0x3cc   :  { %1810 = vst [vmem:[#allocation5 + $0x1a0] sm:$0xff] %v1730_v41  ;;  %v1734_v54 = vadd.f32 %v1733_v44, %v4012_v39  ;;  %2245 = vst [vmem:[#allocation3 + $0x1b0] sm:$0xff] %v2166_v36  ;;  %v1735_v53 = vpop.f32.mrb[119].mxu0  ;;  %v2168_v45 = vpop.f32.mrb[119].mxu1 }
 0x3cd   :  { %1811 = vst [vmem:[#allocation5 + $0x1a8] sm:$0xff] %v1732_v9  ;;  %v1736_v0 = vadd.f32 %v1735_v53, %v4016_v46  ;;  %2246 = vst [vmem:[#allocation3 + $0x1b8] sm:$0xff] %v2168_v45 }
 0x3ce   :  { %1812 = vst [vmem:[#allocation5 + $0x1b0] sm:$0xff] %v1734_v54 }
 0x3cf   :  { %1813 = vst [vmem:[#allocation5 + $0x1b8] sm:$0xff] %v1736_v0 }
 0x3d1   :  { %v1739_v18 = vpop.f32.mrb[120].mxu0  ;;  %v2172_v38 = vpop.f32.mrb[120].mxu1 }
 0x3d2   :  { %v1740_v15 = vadd.f32 %v1739_v18, %v4012_v39  ;;  %2247 = vst [vmem:[#allocation3 + $0x1c0] sm:$0xff] %v2172_v38  ;;  %v1741_v28 = vpop.f32.mrb[121].mxu0  ;;  %v2174_v5 = vpop.f32.mrb[121].mxu1 }
 0x3d3   :  { %v1742_v11 = vadd.f32 %v1741_v28, %v4016_v46  ;;  %2248 = vst [vmem:[#allocation3 + $0x1c8] sm:$0xff] %v2174_v5  ;;  %v1743_v21 = vpop.f32.mrb[122].mxu0  ;;  %v2176_v10 = vpop.f32.mrb[122].mxu1 }
 0x3d4   :  { %1814 = vst [vmem:[#allocation5 + $0x1c0] sm:$0xff] %v1740_v15  ;;  %v1744_v61 = vadd.f32 %v1743_v21, %v4012_v39  ;;  %2249 = vst [vmem:[#allocation3 + $0x1d0] sm:$0xff] %v2176_v10  ;;  %v1745_v63 = vpop.f32.mrb[123].mxu0  ;;  %v2178_v43 = vpop.f32.mrb[123].mxu1 }
 0x3d5   :  { %1815 = vst [vmem:[#allocation5 + $0x1c8] sm:$0xff] %v1742_v11  ;;  %v1746_v31 = vadd.f32 %v1745_v63, %v4016_v46  ;;  %2250 = vst [vmem:[#allocation3 + $0x1d8] sm:$0xff] %v2178_v43 }
 0x3d6   :  { %1816 = vst [vmem:[#allocation5 + $0x1d0] sm:$0xff] %v1744_v61 }
 0x3d7   :  { %1817 = vst [vmem:[#allocation5 + $0x1d8] sm:$0xff] %v1746_v31 }
 0x3d9   :  { %v1749_v17 = vpop.f32.mrb[124].mxu0  ;;  %v2182_v22 = vpop.f32.mrb[124].mxu1 }
 0x3da   :  { %v1750_v58 = vadd.f32 %v1749_v17, %v4012_v39  ;;  %2251 = vst [vmem:[#allocation3 + $0x1e0] sm:$0xff] %v2182_v22  ;;  %v1751_v26 = vpop.f32.mrb[125].mxu0  ;;  %v2184_v48 = vpop.f32.mrb[125].mxu1 }
 0x3db   :  { %v1752_v37 = vadd.f32 %v1751_v26, %v4016_v46  ;;  %2252 = vst [vmem:[#allocation3 + $0x1e8] sm:$0xff] %v2184_v48  ;;  %v1753_v40 = vpop.f32.mrb[126].mxu0  ;;  %v2186_v1 = vpop.f32.mrb[126].mxu1 }
 0x3dc   :  { %1818 = vst [vmem:[#allocation5 + $0x1e0] sm:$0xff] %v1750_v58  ;;  %v1754_v2 = vadd.f32 %v1753_v40, %v4012_v39  ;;  %2253 = vst [vmem:[#allocation3 + $0x1f0] sm:$0xff] %v2186_v1  ;;  %v1755_v23 = vpop.f32.mrb[127].mxu0  ;;  %v2188_v56 = vpop.f32.mrb[127].mxu1 }
 0x3dd   :  { %1819 = vst [vmem:[#allocation5 + $0x1e8] sm:$0xff] %v1752_v37  ;;  %v1756_v60 = vadd.f32 %v1755_v23, %v4016_v46  ;;  %2254 = vst [vmem:[#allocation3 + $0x1f8] sm:$0xff] %v2188_v56 }
 0x3de   :  { %1820 = vst [vmem:[#allocation5 + $0x1f0] sm:$0xff] %v1754_v2 }
 0x3df   :  { %2897 = shalt.err (!%p2894_p12)
}
 0x3e0   :  { %s2898_s26 = scalar_lea.hbm %s4166_s9, 8192 }
 0x3e1   :  { %p2899_p13 = scmp.ne.s32.totalorder %s4166_s9, %s2898_s26  ;;  %p2902_p0 = scmp.lt.u32.totalorder %s2898_s26, %s4166_s9 }
 0x3e3   :  { %p2904_p1 = pnand %p2902_p0, %p2899_p13 }
 0x3e5   :  { %2907 = shalt.err (!%p2904_p1)
}
 0x3e6   :  { %s2965_s8 = smov 256   ;;  %s2966_s28 = smov 16   ;;  %1821 = vst [vmem:[#allocation5 + $0x1f8] sm:$0xff] %v1756_v60 }
 0x3e7   :  { %2266 = dma.vmem_to_hbm [thread:$0]  %s4095_s4, 8192, %s4166_s9, [#allocation4], %s2965_s8, %s2965_s8, %s2966_s28  }
 0x3e8   :  { %s2908_s13 = scalar_lea.vmem %s4099_s20, 8192  ;;  %p2913_p3 = scmp.lt.s32.totalorder %s4099_s20, %s4099_s20 }
 0x3e9   :  { %p2909_p2 = scmp.ne.s32.totalorder %s4099_s20, %s2908_s13  ;;  %p2914_p4 = scmp.lt.s32.totalorder %s2908_s13, %s2908_s13 }
 0x3eb   :  { %p2915_p5 = por %p2914_p4, %p2913_p3 }
 0x3ed   :  { %p2916_p6 = pnand %p2915_p5, %p2909_p2 }
 0x3ef   :  { %2919 = shalt.err (!%p2916_p6)
}
 0x3f0   :  { %s2920_s15 = scalar_lea.hbm %s4167_s10, 8192 }
 0x3f1   :  { %p2921_p7 = scmp.ne.s32.totalorder %s4167_s10, %s2920_s15  ;;  %p2924_p8 = scmp.lt.u32.totalorder %s2920_s15, %s4167_s10 }
 0x3f3   :  { %p2926_p9 = pnand %p2924_p8, %p2921_p7 }
 0x3f5   :  { %2929 = shalt.err (!%p2926_p9)
}
 0x3f6   :  { %2278 = dma.vmem_to_hbm [thread:$0]  %s4099_s20, 8192, %s4167_s10, [#allocation6], %s2965_s8, %s2965_s8, %s2966_s28  }
 0x3f7   :  { %s2930_s4 = scalar_lea.vmem %s4101_s22, 4096  ;;  %p2935_p11 = scmp.lt.s32.totalorder %s4101_s22, %s4101_s22 }
 0x3f8   :  { %p2931_p10 = scmp.ne.s32.totalorder %s4101_s22, %s2930_s4  ;;  %p2936_p12 = scmp.lt.s32.totalorder %s2930_s4, %s2930_s4 }
 0x3fa   :  { %p2937_p13 = por %p2936_p12, %p2935_p11 }
 0x3fc   :  { %p2938_p0 = pnand %p2937_p13, %p2931_p10 }
 0x3fe   :  { %2941 = shalt.err (!%p2938_p0)
}
 0x3ff   :  { %s2942_s23 = scalar_lea.hbm %s4168_s11, 4096 }
 0x400   :  { %p2943_p1 = scmp.ne.s32.totalorder %s4168_s11, %s2942_s23  ;;  %p2946_p2 = scmp.lt.u32.totalorder %s2942_s23, %s4168_s11 }
 0x402   :  { %p2948_p3 = pnand %p2946_p2, %p2943_p1 }
 0x404   :  { %2951 = shalt.err (!%p2948_p3)
}
 0x405   :  { %2290 = dma.vmem_to_hbm [thread:$0]  %s4101_s22, 4096, %s4168_s11, [#allocation6], %s2960_s16, %s2960_s16, %s2961_s17  }
 0x406   :  { %2952 = dma.done.wait [#allocation4], 8192  }
 0x407   :  { %2953 = vsyncadd [#allocation4], 4294959104 }
 0x408   :  { %2954 = dma.done.wait [#allocation6], 12288  }
 0x409   :  { %2955 = vsyncadd [#allocation6], 4294955008 }
 0x40a   :  { %2956 = dma.done.wait [#allocation9], 4096  }
 0x40b   :  { %2957 = vsyncadd [#allocation9], 4294963200 }
 0x40c   :  { %2315 = vsyncpa [#allocation4], 1 }
 0x40d   :  { %2316 = vsyncpa [#allocation6], 1 }
 0x40e   :  { %2317 = vsyncpa [#allocation9], 1 }

</bundles_post_ra>
